<compile_context>
chip_gen: v7x
topology: tpu7x:2x2x1
jax: 0.10.0
libtpu: 0.0.40
codegen_flags: <defaults>
</compile_context>

<pallas_src>
import numpy as np
import jax
import jax.numpy as jnp
from jax.experimental import pallas as pl
from jax.experimental.pallas import tpu as pltpu


def _distogram_kernel(ti_ref, tj_ref, zji_i_ref, zji_j_ref,   # scalar prefetch (SMEM)
                      z_ij_ref, z_ji_ref, w_ref, b2_ref,      # VMEM inputs
                      o_ref,                                   # HBM output (pl.ANY)
                      sym_buf, symT_buf, sem, pend_ref):       # scratch
    # ti/tj           : (num_pairs,) int32 upper-triangle tile indices
    # zji_i/zji_j     : (num_pairs,) int32 z_ji block tables (only used by index_map)
    # z_ij/z_ji       : (1, TN, TN, C) VMEM tiles  z[b, i, j] / z[b, j, i]
    # w_ref           : (C, no_bins) VMEM, b2_ref: (1, no_bins) f32 VMEM (= 2*b)
    # o_ref           : (B, N, N*no_bins) raw HBM ref
    # sym_buf/symT_buf: (2, TN, TN*no_bins) double-buffered staging
    # sem             : DMA sems, [0]=sym path, [1]=symT path, per slot
    # pend_ref        : SMEM (2,) int32 — "symT DMA in flight" flag per slot
    del zji_i_ref, zji_j_ref

    bi = pl.program_id(0)
    t = pl.program_id(1)
    last = pl.num_programs(1) - 1

    i = ti_ref[t]
    j = tj_ref[t]
    off_diag = i != j
    slot = t % 2

    tn = z_ij_ref.shape[1]
    c = z_ij_ref.shape[3]
    nb = w_ref.shape[1]

    # Wait descriptors: only the semaphore + transfer size matter for .wait(),
    # so mirror the real copy's shapes (VMEM staging slab -> HBM tile slice).
    def _wait_sym(s):
        pltpu.make_async_copy(
            sym_buf.at[s],
            o_ref.at[bi, pl.ds(0, tn), pl.ds(0, tn * nb)],
            sem.at[0, s]).wait()

    def _wait_symT(s):
        pltpu.make_async_copy(
            symT_buf.at[s],
            o_ref.at[bi, pl.ds(0, tn), pl.ds(0, tn * nb)],
            sem.at[1, s]).wait()

    # Per-batch-element init of the pending flags (SMEM scratch is
    # uninitialised at kernel start and persists across grid steps).
    @pl.when(t == 0)
    def _():
        pend_ref[0] = 0
        pend_ref[1] = 0

    # ---- compute the (i, j)-side matmul (always needed) --------------------
    w = w_ref[...]
    b2 = b2_ref[...]                                    # (1, no_bins), already 2*b
    a = jnp.dot(z_ij_ref[0].reshape(tn * tn, c), w,
                preferred_element_type=jnp.float32).reshape(tn, tn, nb)
    a_t = jnp.transpose(a, (1, 0, 2))

    # ---- slot-reuse waits: only the DMAs issued two steps earlier ----------
    @pl.when(t >= 2)
    def _():
        _wait_sym(slot)

    @pl.when(pend_ref[slot] == 1)
    def _():
        _wait_symT(slot)

    # ---- stage output tiles and launch the writeback DMAs ------------------
    row_i = pl.multiple_of(i * tn, tn)
    row_j = pl.multiple_of(j * tn, tn)
    col_i = pl.multiple_of(i * (tn * nb), tn * nb)
    col_j = pl.multiple_of(j * (tn * nb), tn * nb)

    @pl.when(off_diag)
    def _():
        bm = jnp.dot(z_ji_ref[0].reshape(tn * tn, c), w,
                     preferred_element_type=jnp.float32).reshape(tn, tn, nb)
        sym_buf[slot] = (a + jnp.transpose(bm, (1, 0, 2)) + b2).reshape(
            tn, tn * nb).astype(sym_buf.dtype)
        symT_buf[slot] = (bm + a_t + b2).reshape(tn, tn * nb).astype(symT_buf.dtype)
        pltpu.make_async_copy(
            symT_buf.at[slot],
            o_ref.at[bi, pl.ds(row_j, tn), pl.ds(col_i, tn * nb)],
            sem.at[1, slot]).start()

    @pl.when(jnp.logical_not(off_diag))
    def _():
        # Diagonal tile: symmetric, single output tile.  The z_ji buffer holds
        # stale data (its DMA was skipped), so only z_ij is used.
        sym_buf[slot] = (a + a_t + b2).reshape(tn, tn * nb).astype(sym_buf.dtype)

    pltpu.make_async_copy(
        sym_buf.at[slot],
        o_ref.at[bi, pl.ds(row_i, tn), pl.ds(col_j, tn * nb)],
        sem.at[0, slot]).start()

    pend_ref[slot] = off_diag.astype(jnp.int32)

    # ---- drain every in-flight DMA on the last pair of this batch element --
    @pl.when(t == last)
    def _():
        _wait_sym(slot)                 # the sym DMA issued this step

        @pl.when(t >= 1)
        def _():
            _wait_sym(1 - slot)         # the sym DMA issued at step t-1

        @pl.when(pend_ref[0] == 1)
        def _():
            _wait_symT(0)
            pend_ref[0] = 0

        @pl.when(pend_ref[1] == 1)
        def _():
            _wait_symT(1)
            pend_ref[1] = 0


def _detect_vmem_bytes():
    try:
        info = pltpu.get_tpu_info()
        for name in ("vmem_capacity_bytes", "vmem_bytes", "vmem_size_bytes"):
            v = getattr(info, name, None)
            if v:
                return int(v)
    except Exception:
        pass
    return 64 * 1024 * 1024          # conservative (v7x-sized) fallback


def _working_set_bytes(tile_n, c, no_bins, in_itemsize, out_itemsize):
    lane = 128
    c_pad = -(-c // lane) * lane
    nb_pad = -(-no_bins // lane) * lane
    z_block = tile_n * tile_n * c_pad * in_itemsize        # one z tile buffer
    staging = tile_n * tile_n * no_bins * out_itemsize     # lane-dense staging slab
    temps = 5 * tile_n * tile_n * nb_pad * 4               # f32 intermediates (A, A^T, Bm, sym, symT)
    weights = 2 * c_pad * nb_pad * max(in_itemsize, 4) + 4096
    return 2 * 2 * z_block + 2 * 2 * staging + temps + weights


def _pick_tile_n(n, c, no_bins, in_itemsize, out_itemsize, budget_bytes):
    tn = 128
    while tn > 8 and (n % tn != 0 or
                      _working_set_bytes(tn, c, no_bins, in_itemsize,
                                         out_itemsize) > budget_bytes):
        tn //= 2
    return min(tn, n)


def distogram_head(z, w, b, *, tile_n=None, vmem_limit_bytes=None):
    """AlphaFold2 DistogramHead forward.

    z: [*, N_res, N_res, c_z] pair embedding
    w: [c_z, no_bins]  (transpose of the torch nn.Linear weight)
    b: [no_bins]
    returns: [*, N_res, N_res, no_bins]
    """
    assert z.ndim >= 3
    orig_shape = z.shape
    N, N2, C = z.shape[-3], z.shape[-2], z.shape[-1]
    assert N == N2, "pair embedding must be square over the residue axes"
    no_bins = int(w.shape[-1])
    assert w.shape[0] == C

    z4 = z.reshape((-1, N, N, C))
    B = z4.shape[0]
    out_dtype = z.dtype
    in_itemsize = jnp.dtype(z.dtype).itemsize
    out_itemsize = jnp.dtype(out_dtype).itemsize

    vmem_bytes = _detect_vmem_bytes()
    if tile_n is None:
        tile_n = _pick_tile_n(N, C, no_bins, in_itemsize, out_itemsize,
                              int(vmem_bytes * 0.75))
    tile_n = min(tile_n, N)
    # TODO(synk): pad ragged residue tiles instead of asserting divisibility.
    assert N % tile_n == 0, f"N_res={N} must be divisible by tile_n={tile_n}"
    nt = N // tile_n

    # Upper-triangle tile-pair tables (i <= j), scalar-prefetched into SMEM.
    pairs = [(i, j) for i in range(nt) for j in range(i, nt)]
    num_pairs = len(pairs)
    ti = np.array([p[0] for p in pairs], dtype=np.int32)
    tj = np.array([p[1] for p in pairs], dtype=np.int32)
    # z_ji block tables: on diagonal pairs, repeat the previous step's block so
    # Pallas skips the redundant DMA (the kernel never reads z_ji on diagonals).
    zji_i = np.empty(num_pairs, np.int32)
    zji_j = np.empty(num_pairs, np.int32)
    prev = (pairs[0][1], pairs[0][0])
    for t, (i, j) in enumerate(pairs):
        if i == j and t > 0:
            zji_i[t], zji_j[t] = prev
        else:
            zji_i[t], zji_j[t] = j, i
        prev = (int(zji_i[t]), int(zji_j[t]))

    w = w.astype(z.dtype)
    b2 = (2.0 * b.astype(jnp.float32)).reshape(1, no_bins)   # bias folded: 2*b

    z_ij_spec = pl.BlockSpec(
        (1, tile_n, tile_n, C),
        lambda bi, t, ti_r, tj_r, zi_r, zj_r: (bi, ti_r[t], tj_r[t], 0))
    z_ji_spec = pl.BlockSpec(
        (1, tile_n, tile_n, C),
        lambda bi, t, ti_r, tj_r, zi_r, zj_r: (bi, zi_r[t], zj_r[t], 0))
    w_spec = pl.BlockSpec((C, no_bins),
                          lambda bi, t, ti_r, tj_r, zi_r, zj_r: (0, 0))
    b_spec = pl.BlockSpec((1, no_bins),
                          lambda bi, t, ti_r, tj_r, zi_r, zj_r: (0, 0))
    o_spec = pl.BlockSpec(memory_space=pl.ANY)   # tiles written by manual DMA

    # Two matmuls per off-diagonal pair, one per diagonal -> nt^2 tile matmuls.
    cost = pl.CostEstimate(
        flops=2 * B * nt * nt * tile_n * tile_n * C * no_bins,
        transcendentals=0,
        bytes_accessed=int(
            B * (nt * nt + 1) * tile_n * tile_n * C * in_itemsize   # z read once (+1 diag at t=0)
            + B * N * N * no_bins * out_itemsize                    # output written once
            + C * no_bins * in_itemsize + no_bins * 4))

    if vmem_limit_bytes is None:
        vmem_limit_bytes = min(int(vmem_bytes * 0.85), 110 * 1024 * 1024)

    out = pl.pallas_call(
        _distogram_kernel,
        out_shape=jax.ShapeDtypeStruct((B, N, N * no_bins), out_dtype),
        grid_spec=pltpu.PrefetchScalarGridSpec(
            num_scalar_prefetch=4,
            grid=(B, num_pairs),
            in_specs=[z_ij_spec, z_ji_spec, w_spec, b_spec],
            out_specs=o_spec,
            scratch_shapes=[
                pltpu.VMEM((2, tile_n, tile_n * no_bins), out_dtype),  # sym staging (2 slots)
                pltpu.VMEM((2, tile_n, tile_n * no_bins), out_dtype),  # symT staging (2 slots)
                pltpu.SemaphoreType.DMA((2, 2)),                       # [sym/symT, slot]
                pltpu.SMEM((2,), jnp.int32),                           # symT pending flags
            ],
        ),
        compiler_params=pltpu.CompilerParams(
            # B is megacore-parallel; the pair axis must stay sequential for the
            # slot-reuse waits / drain and the diagonal z_ji DMA-skip tables.
            # TODO(synk): for B == 1, split the pair list across an extra leading
            # parallel axis (one chunk per core) to regain megacore.
            dimension_semantics=("parallel", "arbitrary"),
            vmem_limit_bytes=int(vmem_limit_bytes),
        ),
        cost_estimate=cost,
    )(jnp.asarray(ti), jnp.asarray(tj), jnp.asarray(zji_i), jnp.asarray(zji_j),
      z4, z4, w, b2)

    return out.reshape(orig_shape[:-1] + (no_bins,))


if __name__ == "__main__":
    # Small, deterministic problem: batch=2, N_res=16, c_z=32, no_bins=64.
    key = jax.random.PRNGKey(0)
    kz, kw, kb = jax.random.split(key, 3)

    B, N, C_Z, NO_BINS = 2, 16, 32, 64
    z = jax.random.normal(kz, (B, N, N, C_Z), dtype=jnp.float32)
    # Deterministic Linear(c_z, no_bins) params: weight [C_z, no_bins], bias [no_bins].
    w = (jax.random.normal(kw, (C_Z, NO_BINS), dtype=jnp.float32)
         / jnp.sqrt(jnp.float32(C_Z)))
    bias = jax.random.normal(kb, (NO_BINS,), dtype=jnp.float32) * 0.01

    # Pure-JAX reference.
    ref_logits = jnp.einsum("bijc,cn->bijn", z, w) + bias
    ref = ref_logits + jnp.swapaxes(ref_logits, 1, 2)

    # Multi-tile path (nt=2): exercises diagonal + off-diagonal pairs, the
    # double-buffered writeback, the end-of-batch drain, and the diagonal
    # z_ji DMA skip.
    out = jax.block_until_ready(distogram_head(z, w, bias, tile_n=8))
    assert out.shape == (B, N, N, NO_BINS)
    assert jnp.allclose(out, ref, atol=1e-4, rtol=1e-4)

    # Auto-tiled path (tile_n capped to N -> single diagonal tile per batch).
    out2 = jax.block_until_ready(distogram_head(z, w, bias))
    assert jnp.allclose(out2, ref, atol=1e-4, rtol=1e-4)

    # bf16 pair representation (typical AF2 inference dtype): halves HBM read
    # traffic; MXU still accumulates in f32.
    zb, wb = z.astype(jnp.bfloat16), w.astype(jnp.bfloat16)
    ref_b = jnp.einsum("bijc,cn->bijn", zb.astype(jnp.float32),
                       wb.astype(jnp.float32)) + bias
    ref_b = (ref_b + jnp.swapaxes(ref_b, 1, 2)).astype(jnp.bfloat16)
    out3 = jax.block_until_ready(distogram_head(zb, wb, bias))
    assert out3.dtype == jnp.bfloat16
    assert jnp.allclose(out3.astype(jnp.float32), ref_b.astype(jnp.float32),
                        atol=1e-1, rtol=1e-1)

    print("KERNEL_OK")
</pallas_src>

<mosaic_0001>
module attributes {stable_mosaic.version = 11 : i64} {
  func.func @_distogram_kernel(%arg0: i32, %arg1: i32, %arg2: memref<3xi32, #tpu.memory_space<smem>>, %arg3: memref<3xi32, #tpu.memory_space<smem>>, %arg4: memref<3xi32, #tpu.memory_space<smem>>, %arg5: memref<3xi32, #tpu.memory_space<smem>>, %arg6: memref<1x8x8x32xf32, #tpu.memory_space<vmem>>, %arg7: memref<1x8x8x32xf32, #tpu.memory_space<vmem>>, %arg8: memref<32x64xf32, #tpu.memory_space<vmem>>, %arg9: memref<1x64xf32, #tpu.memory_space<vmem>>, %arg10: memref<2x16x1024xf32, #tpu.memory_space<any>>, %arg11: memref<2x8x512xf32, #tpu.memory_space<vmem>>, %arg12: memref<2x8x512xf32, #tpu.memory_space<vmem>>, %arg13: memref<2x2x!tpu.dma_semaphore, #tpu.memory_space<semaphore_mem>>, %arg14: memref<2xi32, #tpu.memory_space<smem>>) attributes {dimension_semantics = [#tpu.dimension_semantics<parallel>, #tpu.dimension_semantics<arbitrary>], iteration_bounds = array<i64: 2, 3>, scalar_prefetch = 4 : i64, scratch_operands = 4 : i64, tpu.core_type = #tpu.core_type<tc>, window_params = [{transform_indices = @transform_0, window_bounds = array<i64: 1, 8, 8, 32>}, {transform_indices = @transform_1, window_bounds = array<i64: 1, 8, 8, 32>}, {pipeline_mode = #tpu.pipeline_mode<synchronous>, transform_indices = @transform_2, window_bounds = array<i64: 32, 64>}, {pipeline_mode = #tpu.pipeline_mode<synchronous>, transform_indices = @transform_3, window_bounds = array<i64: 1, 64>}, {}]} {
    %0 = arith.index_cast %arg1 : i32 to index
    %1 = memref.load %arg2[%0] : memref<3xi32, #tpu.memory_space<smem>>
    %2 = arith.index_cast %arg1 : i32 to index
    %3 = memref.load %arg3[%2] : memref<3xi32, #tpu.memory_space<smem>>
    %4 = arith.cmpi ne, %1, %3 : i32
    %c2_i32 = arith.constant 2 : i32
    %c0_i32 = arith.constant 0 : i32
    %5 = arith.cmpi eq, %c2_i32, %c0_i32 : i32
    %c1_i32 = arith.constant 1 : i32
    %6 = arith.select %5, %c1_i32, %c2_i32 : i32
    %7 = arith.remsi %arg1, %6 : i32
    %c0_i32_0 = arith.constant 0 : i32
    %8 = arith.cmpi ne, %7, %c0_i32_0 : i32
    %c0_i32_1 = arith.constant 0 : i32
    %9 = arith.cmpi slt, %7, %c0_i32_1 : i32
    %c0_i32_2 = arith.constant 0 : i32
    %10 = arith.cmpi slt, %6, %c0_i32_2 : i32
    %11 = arith.xori %9, %10 : i1
    %12 = arith.andi %11, %8 : i1
    %13 = arith.addi %7, %6 : i32
    %14 = arith.select %12, %13, %7 : i32
    %c0_i32_3 = arith.constant 0 : i32
    %15 = arith.cmpi eq, %arg1, %c0_i32_3 : i32
    %16 = arith.extui %15 : i1 to i32
    %c0_i32_4 = arith.constant 0 : i32
    %17 = arith.cmpi ne, %16, %c0_i32_4 : i32
    scf.if %17 {
      %c0_i32_25 = arith.constant 0 : i32
      %c0_26 = arith.constant 0 : index
      %59 = memref.load %arg14[%c0_26] : memref<2xi32, #tpu.memory_space<smem>>
      memref.store %c0_i32_25, %arg14[%c0_26] : memref<2xi32, #tpu.memory_space<smem>>
      %c0_i32_27 = arith.constant 0 : i32
      %c1 = arith.constant 1 : index
      %60 = memref.load %arg14[%c1] : memref<2xi32, #tpu.memory_space<smem>>
      memref.store %c0_i32_27, %arg14[%c1] : memref<2xi32, #tpu.memory_space<smem>>
    } else {
    }
    %c0 = arith.constant 0 : index
    %c0_5 = arith.constant 0 : index
    %18 = vector.load %arg8[%c0, %c0_5] : memref<32x64xf32, #tpu.memory_space<vmem>>, vector<32x64xf32>
    %c0_6 = arith.constant 0 : index
    %c0_7 = arith.constant 0 : index
    %19 = vector.load %arg9[%c0_6, %c0_7] : memref<1x64xf32, #tpu.memory_space<vmem>>, vector<1x64xf32>
    %c0_8 = arith.constant 0 : index
    %c0_9 = arith.constant 0 : index
    %c0_10 = arith.constant 0 : index
    %c0_11 = arith.constant 0 : index
    %20 = vector.load %arg6[%c0_8, %c0_9, %c0_10, %c0_11] : memref<1x8x8x32xf32, #tpu.memory_space<vmem>>, vector<1x8x8x32xf32>
    %21 = vector.shape_cast %20 : vector<1x8x8x32xf32> to vector<8x8x32xf32>
    %22 = vector.shape_cast %21 : vector<8x8x32xf32> to vector<64x32xf32>
    %cst = arith.constant dense<0.000000e+00> : vector<64x64xf32>
    %23 = tpu.matmul %22, %18, %cst {dimension_numbers = #tpu.dot_dimension_numbers<[1], [0], [0], [1], [0, 0, 1, 1], [], []>} : vector<64x32xf32>, vector<32x64xf32>, vector<64x64xf32> -> vector<64x64xf32>
    %24 = vector.shape_cast %23 : vector<64x64xf32> to vector<8x8x64xf32>
    %25 = tpu.transpose %24, [1, 0, 2] : vector<8x8x64xf32> -> vector<8x8x64xf32>
    %c2_i32_12 = arith.constant 2 : i32
    %26 = arith.cmpi sge, %arg1, %c2_i32_12 : i32
    %27 = arith.extui %26 : i1 to i32
    %c0_i32_13 = arith.constant 0 : i32
    %28 = arith.cmpi ne, %27, %c0_i32_13 : i32
    scf.if %28 {
      %c0_i32_25 = arith.constant 0 : i32
      %c0_i32_26 = arith.constant 0 : i32
      %c0_i32_27 = arith.constant 0 : i32
      %59 = tpu.memref_slice %arg11[%14, %c0_i32_26, %c0_i32_27] : memref<2x8x512xf32, #tpu.memory_space<vmem>> -> memref<1x8x512xf32, #tpu.memory_space<vmem>>
      %60 = tpu.memref_squeeze %59 : memref<1x8x512xf32, #tpu.memory_space<vmem>> -> memref<8x512xf32, #tpu.memory_space<vmem>>
      %c0_i32_28 = arith.constant 0 : i32
      %c0_i32_29 = arith.constant 0 : i32
      %61 = tpu.memref_slice %arg10[%arg0, %c0_i32_28, %c0_i32_29] : memref<2x16x1024xf32, #tpu.memory_space<any>> -> memref<1x8x512xf32, #tpu.memory_space<any>>
      %62 = tpu.memref_squeeze %61 : memref<1x8x512xf32, #tpu.memory_space<any>> -> memref<8x512xf32, #tpu.memory_space<any>>
      %63 = tpu.memref_slice %arg13[%c0_i32_25, %14] : memref<2x2x!tpu.dma_semaphore, #tpu.memory_space<semaphore_mem>> -> memref<1x1x!tpu.dma_semaphore, #tpu.memory_space<semaphore_mem>>
      %64 = tpu.memref_squeeze %63 : memref<1x1x!tpu.dma_semaphore, #tpu.memory_space<semaphore_mem>> -> memref<!tpu.dma_semaphore, #tpu.memory_space<semaphore_mem>>
      tpu.wait_dma2 semaphore(%64 : memref<!tpu.dma_semaphore, #tpu.memory_space<semaphore_mem>>) src(%60 : memref<8x512xf32, #tpu.memory_space<vmem>>) dst(%62 : memref<8x512xf32, #tpu.memory_space<any>>)
    } else {
    }
    %29 = arith.index_cast %14 : i32 to index
    %30 = memref.load %arg14[%29] : memref<2xi32, #tpu.memory_space<smem>>
    %c1_i32_14 = arith.constant 1 : i32
    %31 = arith.cmpi eq, %30, %c1_i32_14 : i32
    %32 = arith.extui %31 : i1 to i32
    %c0_i32_15 = arith.constant 0 : i32
    %33 = arith.cmpi ne, %32, %c0_i32_15 : i32
    scf.if %33 {
      %c1_i32_25 = arith.constant 1 : i32
      %c0_i32_26 = arith.constant 0 : i32
      %c0_i32_27 = arith.constant 0 : i32
      %59 = tpu.memref_slice %arg12[%14, %c0_i32_26, %c0_i32_27] : memref<2x8x512xf32, #tpu.memory_space<vmem>> -> memref<1x8x512xf32, #tpu.memory_space<vmem>>
      %60 = tpu.memref_squeeze %59 : memref<1x8x512xf32, #tpu.memory_space<vmem>> -> memref<8x512xf32, #tpu.memory_space<vmem>>
      %c0_i32_28 = arith.constant 0 : i32
      %c0_i32_29 = arith.constant 0 : i32
      %61 = tpu.memref_slice %arg10[%arg0, %c0_i32_28, %c0_i32_29] : memref<2x16x1024xf32, #tpu.memory_space<any>> -> memref<1x8x512xf32, #tpu.memory_space<any>>
      %62 = tpu.memref_squeeze %61 : memref<1x8x512xf32, #tpu.memory_space<any>> -> memref<8x512xf32, #tpu.memory_space<any>>
      %63 = tpu.memref_slice %arg13[%c1_i32_25, %14] : memref<2x2x!tpu.dma_semaphore, #tpu.memory_space<semaphore_mem>> -> memref<1x1x!tpu.dma_semaphore, #tpu.memory_space<semaphore_mem>>
      %64 = tpu.memref_squeeze %63 : memref<1x1x!tpu.dma_semaphore, #tpu.memory_space<semaphore_mem>> -> memref<!tpu.dma_semaphore, #tpu.memory_space<semaphore_mem>>
      tpu.wait_dma2 semaphore(%64 : memref<!tpu.dma_semaphore, #tpu.memory_space<semaphore_mem>>) src(%60 : memref<8x512xf32, #tpu.memory_space<vmem>>) dst(%62 : memref<8x512xf32, #tpu.memory_space<any>>)
    } else {
    }
    %c8_i32 = arith.constant 8 : i32
    %34 = arith.muli %1, %c8_i32 : i32
    %35 = tpu.assume_multiple %34, 8 : i32
    %c8_i32_16 = arith.constant 8 : i32
    %36 = arith.muli %3, %c8_i32_16 : i32
    %37 = tpu.assume_multiple %36, 8 : i32
    %c512_i32 = arith.constant 512 : i32
    %38 = arith.muli %1, %c512_i32 : i32
    %39 = tpu.assume_multiple %38, 512 : i32
    %c512_i32_17 = arith.constant 512 : i32
    %40 = arith.muli %3, %c512_i32_17 : i32
    %41 = tpu.assume_multiple %40, 512 : i32
    %42 = arith.extui %4 : i1 to i32
    %c0_i32_18 = arith.constant 0 : i32
    %43 = arith.cmpi ne, %42, %c0_i32_18 : i32
    scf.if %43 {
      %c0_25 = arith.constant 0 : index
      %c0_26 = arith.constant 0 : index
      %c0_27 = arith.constant 0 : index
      %c0_28 = arith.constant 0 : index
      %59 = vector.load %arg7[%c0_25, %c0_26, %c0_27, %c0_28] : memref<1x8x8x32xf32, #tpu.memory_space<vmem>>, vector<1x8x8x32xf32>
      %60 = vector.shape_cast %59 : vector<1x8x8x32xf32> to vector<8x8x32xf32>
      %61 = vector.shape_cast %60 : vector<8x8x32xf32> to vector<64x32xf32>
      %cst_29 = arith.constant dense<0.000000e+00> : vector<64x64xf32>
      %62 = tpu.matmul %61, %18, %cst_29 {dimension_numbers = #tpu.dot_dimension_numbers<[1], [0], [0], [1], [0, 0, 1, 1], [], []>} : vector<64x32xf32>, vector<32x64xf32>, vector<64x64xf32> -> vector<64x64xf32>
      %63 = vector.shape_cast %62 : vector<64x64xf32> to vector<8x8x64xf32>
      %64 = tpu.transpose %63, [1, 0, 2] : vector<8x8x64xf32> -> vector<8x8x64xf32>
      %65 = arith.addf %24, %64 : vector<8x8x64xf32>
      %66 = vector.shape_cast %19 : vector<1x64xf32> to vector<1x1x64xf32>
      %67 = vector.broadcast %66 : vector<1x1x64xf32> to vector<8x8x64xf32>
      %68 = arith.addf %65, %67 : vector<8x8x64xf32>
      %69 = vector.shape_cast %68 : vector<8x8x64xf32> to vector<8x512xf32>
      %70 = arith.index_cast %14 : i32 to index
      %c0_30 = arith.constant 0 : index
      %c0_31 = arith.constant 0 : index
      %71 = vector.load %arg11[%70, %c0_30, %c0_31] : memref<2x8x512xf32, #tpu.memory_space<vmem>>, vector<1x8x512xf32>
      %72 = vector.shape_cast %71 : vector<1x8x512xf32> to vector<8x512xf32>
      %73 = vector.shape_cast %69 : vector<8x512xf32> to vector<1x8x512xf32>
      tpu.vector_store %arg11[%70, %c0_30, %c0_31], %73 {strides = array<i32>} : memref<2x8x512xf32, #tpu.memory_space<vmem>>, vector<1x8x512xf32>,
      %74 = arith.addf %63, %25 : vector<8x8x64xf32>
      %75 = vector.shape_cast %19 : vector<1x64xf32> to vector<1x1x64xf32>
      %76 = vector.broadcast %75 : vector<1x1x64xf32> to vector<8x8x64xf32>
      %77 = arith.addf %74, %76 : vector<8x8x64xf32>
      %78 = vector.shape_cast %77 : vector<8x8x64xf32> to vector<8x512xf32>
      %79 = arith.index_cast %14 : i32 to index
      %c0_32 = arith.constant 0 : index
      %c0_33 = arith.constant 0 : index
      %80 = vector.load %arg12[%79, %c0_32, %c0_33] : memref<2x8x512xf32, #tpu.memory_space<vmem>>, vector<1x8x512xf32>
      %81 = vector.shape_cast %80 : vector<1x8x512xf32> to vector<8x512xf32>
      %82 = vector.shape_cast %78 : vector<8x512xf32> to vector<1x8x512xf32>
      tpu.vector_store %arg12[%79, %c0_32, %c0_33], %82 {strides = array<i32>} : memref<2x8x512xf32, #tpu.memory_space<vmem>>, vector<1x8x512xf32>,
      %c1_i32_34 = arith.constant 1 : i32
      %c0_i32_35 = arith.constant 0 : i32
      %c0_i32_36 = arith.constant 0 : i32
      %83 = tpu.memref_slice %arg12[%14, %c0_i32_35, %c0_i32_36] : memref<2x8x512xf32, #tpu.memory_space<vmem>> -> memref<1x8x512xf32, #tpu.memory_space<vmem>>
      %84 = tpu.memref_squeeze %83 : memref<1x8x512xf32, #tpu.memory_space<vmem>> -> memref<8x512xf32, #tpu.memory_space<vmem>>
      %85 = tpu.memref_slice %arg10[%arg0, %37, %39] : memref<2x16x1024xf32, #tpu.memory_space<any>> -> memref<1x8x512xf32, #tpu.memory_space<any>>
      %86 = tpu.memref_squeeze %85 : memref<1x8x512xf32, #tpu.memory_space<any>> -> memref<8x512xf32, #tpu.memory_space<any>>
      %87 = tpu.memref_slice %arg13[%c1_i32_34, %14] : memref<2x2x!tpu.dma_semaphore, #tpu.memory_space<semaphore_mem>> -> memref<1x1x!tpu.dma_semaphore, #tpu.memory_space<semaphore_mem>>
      %88 = tpu.memref_squeeze %87 : memref<1x1x!tpu.dma_semaphore, #tpu.memory_space<semaphore_mem>> -> memref<!tpu.dma_semaphore, #tpu.memory_space<semaphore_mem>>
      tpu.enqueue_dma source(%84 : memref<8x512xf32, #tpu.memory_space<vmem>>) target(%86 : memref<8x512xf32, #tpu.memory_space<any>>) target_semaphore(%88 : memref<!tpu.dma_semaphore, #tpu.memory_space<semaphore_mem>>)
    } else {
    }
    %true = arith.constant true
    %44 = arith.xori %4, %true : i1
    %45 = arith.extui %44 : i1 to i32
    %c0_i32_19 = arith.constant 0 : i32
    %46 = arith.cmpi ne, %45, %c0_i32_19 : i32
    scf.if %46 {
      %59 = arith.addf %24, %25 : vector<8x8x64xf32>
      %60 = vector.shape_cast %19 : vector<1x64xf32> to vector<1x1x64xf32>
      %61 = vector.broadcast %60 : vector<1x1x64xf32> to vector<8x8x64xf32>
      %62 = arith.addf %59, %61 : vector<8x8x64xf32>
      %63 = vector.shape_cast %62 : vector<8x8x64xf32> to vector<8x512xf32>
      %64 = arith.index_cast %14 : i32 to index
      %c0_25 = arith.constant 0 : index
      %c0_26 = arith.constant 0 : index
      %65 = vector.load %arg11[%64, %c0_25, %c0_26] : memref<2x8x512xf32, #tpu.memory_space<vmem>>, vector<1x8x512xf32>
      %66 = vector.shape_cast %65 : vector<1x8x512xf32> to vector<8x512xf32>
      %67 = vector.shape_cast %63 : vector<8x512xf32> to vector<1x8x512xf32>
      tpu.vector_store %arg11[%64, %c0_25, %c0_26], %67 {strides = array<i32>} : memref<2x8x512xf32, #tpu.memory_space<vmem>>, vector<1x8x512xf32>,
    } else {
    }
    %c0_i32_20 = arith.constant 0 : i32
    %c0_i32_21 = arith.constant 0 : i32
    %c0_i32_22 = arith.constant 0 : i32
    %47 = tpu.memref_slice %arg11[%14, %c0_i32_21, %c0_i32_22] : memref<2x8x512xf32, #tpu.memory_space<vmem>> -> memref<1x8x512xf32, #tpu.memory_space<vmem>>
    %48 = tpu.memref_squeeze %47 : memref<1x8x512xf32, #tpu.memory_space<vmem>> -> memref<8x512xf32, #tpu.memory_space<vmem>>
    %49 = tpu.memref_slice %arg10[%arg0, %35, %41] : memref<2x16x1024xf32, #tpu.memory_space<any>> -> memref<1x8x512xf32, #tpu.memory_space<any>>
    %50 = tpu.memref_squeeze %49 : memref<1x8x512xf32, #tpu.memory_space<any>> -> memref<8x512xf32, #tpu.memory_space<any>>
    %51 = tpu.memref_slice %arg13[%c0_i32_20, %14] : memref<2x2x!tpu.dma_semaphore, #tpu.memory_space<semaphore_mem>> -> memref<1x1x!tpu.dma_semaphore, #tpu.memory_space<semaphore_mem>>
    %52 = tpu.memref_squeeze %51 : memref<1x1x!tpu.dma_semaphore, #tpu.memory_space<semaphore_mem>> -> memref<!tpu.dma_semaphore, #tpu.memory_space<semaphore_mem>>
    tpu.enqueue_dma source(%48 : memref<8x512xf32, #tpu.memory_space<vmem>>) target(%50 : memref<8x512xf32, #tpu.memory_space<any>>) target_semaphore(%52 : memref<!tpu.dma_semaphore, #tpu.memory_space<semaphore_mem>>)
    %53 = arith.extui %4 : i1 to i32
    %54 = arith.index_cast %14 : i32 to index
    %55 = memref.load %arg14[%54] : memref<2xi32, #tpu.memory_space<smem>>
    memref.store %53, %arg14[%54] : memref<2xi32, #tpu.memory_space<smem>>
    %c2_i32_23 = arith.constant 2 : i32
    %56 = arith.cmpi eq, %arg1, %c2_i32_23 : i32
    %57 = arith.extui %56 : i1 to i32
    %c0_i32_24 = arith.constant 0 : i32
    %58 = arith.cmpi ne, %57, %c0_i32_24 : i32
    scf.if %58 {
      %c0_i32_25 = arith.constant 0 : i32
      %c0_i32_26 = arith.constant 0 : i32
      %c0_i32_27 = arith.constant 0 : i32
      %59 = tpu.memref_slice %arg11[%14, %c0_i32_26, %c0_i32_27] : memref<2x8x512xf32, #tpu.memory_space<vmem>> -> memref<1x8x512xf32, #tpu.memory_space<vmem>>
      %60 = tpu.memref_squeeze %59 : memref<1x8x512xf32, #tpu.memory_space<vmem>> -> memref<8x512xf32, #tpu.memory_space<vmem>>
      %c0_i32_28 = arith.constant 0 : i32
      %c0_i32_29 = arith.constant 0 : i32
      %61 = tpu.memref_slice %arg10[%arg0, %c0_i32_28, %c0_i32_29] : memref<2x16x1024xf32, #tpu.memory_space<any>> -> memref<1x8x512xf32, #tpu.memory_space<any>>
      %62 = tpu.memref_squeeze %61 : memref<1x8x512xf32, #tpu.memory_space<any>> -> memref<8x512xf32, #tpu.memory_space<any>>
      %63 = tpu.memref_slice %arg13[%c0_i32_25, %14] : memref<2x2x!tpu.dma_semaphore, #tpu.memory_space<semaphore_mem>> -> memref<1x1x!tpu.dma_semaphore, #tpu.memory_space<semaphore_mem>>
      %64 = tpu.memref_squeeze %63 : memref<1x1x!tpu.dma_semaphore, #tpu.memory_space<semaphore_mem>> -> memref<!tpu.dma_semaphore, #tpu.memory_space<semaphore_mem>>
      tpu.wait_dma2 semaphore(%64 : memref<!tpu.dma_semaphore, #tpu.memory_space<semaphore_mem>>) src(%60 : memref<8x512xf32, #tpu.memory_space<vmem>>) dst(%62 : memref<8x512xf32, #tpu.memory_space<any>>)
      %c1_i32_30 = arith.constant 1 : i32
      %65 = arith.cmpi sge, %arg1, %c1_i32_30 : i32
      %66 = arith.extui %65 : i1 to i32
      %c0_i32_31 = arith.constant 0 : i32
      %67 = arith.cmpi ne, %66, %c0_i32_31 : i32
      scf.if %67 {
        %c1_i32_37 = arith.constant 1 : i32
        %76 = arith.subi %c1_i32_37, %14 : i32
        %c0_i32_38 = arith.constant 0 : i32
        %c0_i32_39 = arith.constant 0 : i32
        %c0_i32_40 = arith.constant 0 : i32
        %77 = tpu.memref_slice %arg11[%76, %c0_i32_39, %c0_i32_40] : memref<2x8x512xf32, #tpu.memory_space<vmem>> -> memref<1x8x512xf32, #tpu.memory_space<vmem>>
        %78 = tpu.memref_squeeze %77 : memref<1x8x512xf32, #tpu.memory_space<vmem>> -> memref<8x512xf32, #tpu.memory_space<vmem>>
        %c0_i32_41 = arith.constant 0 : i32
        %c0_i32_42 = arith.constant 0 : i32
        %79 = tpu.memref_slice %arg10[%arg0, %c0_i32_41, %c0_i32_42] : memref<2x16x1024xf32, #tpu.memory_space<any>> -> memref<1x8x512xf32, #tpu.memory_space<any>>
        %80 = tpu.memref_squeeze %79 : memref<1x8x512xf32, #tpu.memory_space<any>> -> memref<8x512xf32, #tpu.memory_space<any>>
        %81 = tpu.memref_slice %arg13[%c0_i32_38, %76] : memref<2x2x!tpu.dma_semaphore, #tpu.memory_space<semaphore_mem>> -> memref<1x1x!tpu.dma_semaphore, #tpu.memory_space<semaphore_mem>>
        %82 = tpu.memref_squeeze %81 : memref<1x1x!tpu.dma_semaphore, #tpu.memory_space<semaphore_mem>> -> memref<!tpu.dma_semaphore, #tpu.memory_space<semaphore_mem>>
        tpu.wait_dma2 semaphore(%82 : memref<!tpu.dma_semaphore, #tpu.memory_space<semaphore_mem>>) src(%78 : memref<8x512xf32, #tpu.memory_space<vmem>>) dst(%80 : memref<8x512xf32, #tpu.memory_space<any>>)
      } else {
      }
      %c0_32 = arith.constant 0 : index
      %68 = memref.load %arg14[%c0_32] : memref<2xi32, #tpu.memory_space<smem>>
      %c1_i32_33 = arith.constant 1 : i32
      %69 = arith.cmpi eq, %68, %c1_i32_33 : i32
      %70 = arith.extui %69 : i1 to i32
      %c0_i32_34 = arith.constant 0 : i32
      %71 = arith.cmpi ne, %70, %c0_i32_34 : i32
      scf.if %71 {
        %c0_i32_37 = arith.constant 0 : i32
        %c1_i32_38 = arith.constant 1 : i32
        %c0_i32_39 = arith.constant 0 : i32
        %c0_i32_40 = arith.constant 0 : i32
        %c0_i32_41 = arith.constant 0 : i32
        %76 = tpu.memref_slice %arg12[%c0_i32_37, %c0_i32_40, %c0_i32_41] : memref<2x8x512xf32, #tpu.memory_space<vmem>> -> memref<1x8x512xf32, #tpu.memory_space<vmem>>
        %77 = tpu.memref_squeeze %76 : memref<1x8x512xf32, #tpu.memory_space<vmem>> -> memref<8x512xf32, #tpu.memory_space<vmem>>
        %c0_i32_42 = arith.constant 0 : i32
        %c0_i32_43 = arith.constant 0 : i32
        %78 = tpu.memref_slice %arg10[%arg0, %c0_i32_42, %c0_i32_43] : memref<2x16x1024xf32, #tpu.memory_space<any>> -> memref<1x8x512xf32, #tpu.memory_space<any>>
        %79 = tpu.memref_squeeze %78 : memref<1x8x512xf32, #tpu.memory_space<any>> -> memref<8x512xf32, #tpu.memory_space<any>>
        %80 = tpu.memref_slice %arg13[%c1_i32_38, %c0_i32_39] : memref<2x2x!tpu.dma_semaphore, #tpu.memory_space<semaphore_mem>> -> memref<1x1x!tpu.dma_semaphore, #tpu.memory_space<semaphore_mem>>
        %81 = tpu.memref_squeeze %80 : memref<1x1x!tpu.dma_semaphore, #tpu.memory_space<semaphore_mem>> -> memref<!tpu.dma_semaphore, #tpu.memory_space<semaphore_mem>>
        tpu.wait_dma2 semaphore(%81 : memref<!tpu.dma_semaphore, #tpu.memory_space<semaphore_mem>>) src(%77 : memref<8x512xf32, #tpu.memory_space<vmem>>) dst(%79 : memref<8x512xf32, #tpu.memory_space<any>>)
        %c0_i32_44 = arith.constant 0 : i32
        %c0_45 = arith.constant 0 : index
        %82 = memref.load %arg14[%c0_45] : memref<2xi32, #tpu.memory_space<smem>>
        memref.store %c0_i32_44, %arg14[%c0_45] : memref<2xi32, #tpu.memory_space<smem>>
      } else {
      }
      %c1 = arith.constant 1 : index
      %72 = memref.load %arg14[%c1] : memref<2xi32, #tpu.memory_space<smem>>
      %c1_i32_35 = arith.constant 1 : i32
      %73 = arith.cmpi eq, %72, %c1_i32_35 : i32
      %74 = arith.extui %73 : i1 to i32
      %c0_i32_36 = arith.constant 0 : i32
      %75 = arith.cmpi ne, %74, %c0_i32_36 : i32
      scf.if %75 {
        %c1_i32_37 = arith.constant 1 : i32
        %c1_i32_38 = arith.constant 1 : i32
        %c1_i32_39 = arith.constant 1 : i32
        %c0_i32_40 = arith.constant 0 : i32
        %c0_i32_41 = arith.constant 0 : i32
        %76 = tpu.memref_slice %arg12[%c1_i32_37, %c0_i32_40, %c0_i32_41] : memref<2x8x512xf32, #tpu.memory_space<vmem>> -> memref<1x8x512xf32, #tpu.memory_space<vmem>>
        %77 = tpu.memref_squeeze %76 : memref<1x8x512xf32, #tpu.memory_space<vmem>> -> memref<8x512xf32, #tpu.memory_space<vmem>>
        %c0_i32_42 = arith.constant 0 : i32
        %c0_i32_43 = arith.constant 0 : i32
        %78 = tpu.memref_slice %arg10[%arg0, %c0_i32_42, %c0_i32_43] : memref<2x16x1024xf32, #tpu.memory_space<any>> -> memref<1x8x512xf32, #tpu.memory_space<any>>
        %79 = tpu.memref_squeeze %78 : memref<1x8x512xf32, #tpu.memory_space<any>> -> memref<8x512xf32, #tpu.memory_space<any>>
        %80 = tpu.memref_slice %arg13[%c1_i32_38, %c1_i32_39] : memref<2x2x!tpu.dma_semaphore, #tpu.memory_space<semaphore_mem>> -> memref<1x1x!tpu.dma_semaphore, #tpu.memory_space<semaphore_mem>>
        %81 = tpu.memref_squeeze %80 : memref<1x1x!tpu.dma_semaphore, #tpu.memory_space<semaphore_mem>> -> memref<!tpu.dma_semaphore, #tpu.memory_space<semaphore_mem>>
        tpu.wait_dma2 semaphore(%81 : memref<!tpu.dma_semaphore, #tpu.memory_space<semaphore_mem>>) src(%77 : memref<8x512xf32, #tpu.memory_space<vmem>>) dst(%79 : memref<8x512xf32, #tpu.memory_space<any>>)
        %c0_i32_44 = arith.constant 0 : i32
        %c1_45 = arith.constant 1 : index
        %82 = memref.load %arg14[%c1_45] : memref<2xi32, #tpu.memory_space<smem>>
        memref.store %c0_i32_44, %arg14[%c1_45] : memref<2xi32, #tpu.memory_space<smem>>
      } else {
      }
    } else {
    }
    return
  }
  func.func @transform_0(%arg0: i32, %arg1: i32, %arg2: memref<3xi32, #tpu.memory_space<smem>>, %arg3: memref<3xi32, #tpu.memory_space<smem>>, %arg4: memref<3xi32, #tpu.memory_space<smem>>, %arg5: memref<3xi32, #tpu.memory_space<smem>>) -> (i32, i32, i32, i32) {
    %0 = arith.index_cast %arg1 : i32 to index
    %1 = memref.load %arg2[%0] : memref<3xi32, #tpu.memory_space<smem>>
    %2 = arith.index_cast %arg1 : i32 to index
    %3 = memref.load %arg3[%2] : memref<3xi32, #tpu.memory_space<smem>>
    %c0_i32 = arith.constant 0 : i32
    %c0_i32_0 = arith.constant 0 : i32
    return %arg0, %1, %3, %c0_i32 : i32, i32, i32, i32
  }
  func.func @transform_1(%arg0: i32, %arg1: i32, %arg2: memref<3xi32, #tpu.memory_space<smem>>, %arg3: memref<3xi32, #tpu.memory_space<smem>>, %arg4: memref<3xi32, #tpu.memory_space<smem>>, %arg5: memref<3xi32, #tpu.memory_space<smem>>) -> (i32, i32, i32, i32) {
    %0 = arith.index_cast %arg1 : i32 to index
    %1 = memref.load %arg4[%0] : memref<3xi32, #tpu.memory_space<smem>>
    %2 = arith.index_cast %arg1 : i32 to index
    %3 = memref.load %arg5[%2] : memref<3xi32, #tpu.memory_space<smem>>
    %c0_i32 = arith.constant 0 : i32
    %c0_i32_0 = arith.constant 0 : i32
    return %arg0, %1, %3, %c0_i32 : i32, i32, i32, i32
  }
  func.func @transform_2(%arg0: i32, %arg1: i32, %arg2: memref<3xi32, #tpu.memory_space<smem>>, %arg3: memref<3xi32, #tpu.memory_space<smem>>, %arg4: memref<3xi32, #tpu.memory_space<smem>>, %arg5: memref<3xi32, #tpu.memory_space<smem>>) -> (i32, i32) {
    %c0_i32 = arith.constant 0 : i32
    %c0_i32_0 = arith.constant 0 : i32
    %c0_i32_1 = arith.constant 0 : i32
    return %c0_i32, %c0_i32_0 : i32, i32
  }
  func.func @transform_3(%arg0: i32, %arg1: i32, %arg2: memref<3xi32, #tpu.memory_space<smem>>, %arg3: memref<3xi32, #tpu.memory_space<smem>>, %arg4: memref<3xi32, #tpu.memory_space<smem>>, %arg5: memref<3xi32, #tpu.memory_space<smem>>) -> (i32, i32) {
    %c0_i32 = arith.constant 0 : i32
    %c0_i32_0 = arith.constant 0 : i32
    %c0_i32_1 = arith.constant 0 : i32
    return %c0_i32, %c0_i32_0 : i32, i32
  }
}

</mosaic_0001>

<bundles_post_ra>
// kernel: tpu_custom_call.1
= control target key start
LH: loop header
LB: loop body
LE: loop exit
PB: predicated region body
PF: predicated region fallthrough
CT: control target
= control target key end

     0   :  { %s3165_s0 = inlined_call_operand.hbm [shape: s32[3], index: 0, kind: input, shape index: {}]   ;;  %s3166_s4 = inlined_call_operand.hbm [shape: f32[2,16,16,32], index: 4, kind: input, shape index: {}]   ;;  %s3167_s5 = inlined_call_operand.hbm [shape: f32[2,16,16,32], index: 5, kind: input, shape index: {}]   ;;  %s3168_s6 = inlined_call_operand.hbm [shape: f32[32,64], index: 6, kind: input, shape index: {}]   ;;  %s3169_s7 = inlined_call_operand.vmem [shape: f32[1,64], index: 7, kind: input, shape index: {}]   ;;  %s3170_s8 = inlined_call_operand.hbm [shape: f32[2,16,1024], index: 8, kind: output, shape index: {}]   ;;  %s3171_s1 = inlined_call_operand.vmem [shape: s32[3], index: 1, kind: input, shape index: {}]   ;;  %s3172_s2 = inlined_call_operand.vmem [shape: s32[3], index: 2, kind: input, shape index: {}]   ;;  %s3173_s3 = inlined_call_operand.vmem [shape: s32[3], index: 3, kind: input, shape index: {}]  }
   0x1   :  { %3198 = sst [smem:[#allocation46_spill]] %s3166_s4  ;;  %s1986_s29 = scalar_lea.hbm %s3165_s0, 16 }
   0x2   :  { %3199 = sst [smem:[#allocation47_spill]] %s3168_s6  ;;  %p1987_p0 = scmp.ne.s32.totalorder %s3165_s0, %s1986_s29 }
   0x3   :  { %3200 = sst [smem:[#allocation48_spill]] %s3169_s7  ;;  %p1990_p1 = scmp.lt.u32.totalorder %s1986_s29, %s3165_s0 }
   0x4   :  { %3201 = sst [smem:[#allocation49_spill]] %s3170_s8 }
   0x5   :  { %p1992_p2 = pnand %p1990_p1, %p1987_p0 }
   0x7   :  { %1995 = shalt.err (!%p1992_p2)  }
   0x8   :  { %s2294_s12 = smov [#allocation7]   ;;  %s15_s17 = sshll.u32 %s3171_s1, 4  ;;  %s16_s17 = int_to_ptr.vmem [resolvable:$true] %s15_s17 }
   0x9   :  { %14 = dma.hbm_to_smem %s3165_s0, 16, %s2294_s12, [#allocation6] }
   0xa   :  { %s19_s20 = sshll.u32 %s3172_s2, 4  ;;  %s1996_s21 = scalar_lea.vmem %s16_s17, 16  ;;  %s20_s20 = int_to_ptr.vmem [resolvable:$true] %s19_s20 }
   0xb   :  { %p1997_p3 = scmp.ne.s32.totalorder %s16_s17, %s1996_s21  ;;  %p2001_p4 = scmp.lt.s32.totalorder %s16_s17, %s16_s17 }
   0xc   :  { %p2002_p5 = scmp.lt.s32.totalorder %s1996_s21, %s1996_s21 }
   0xe   :  { %p2003_p6 = por %p2002_p5, %p2001_p4 }
  0x10   :  { %p2004_p7 = pnand %p2003_p6, %p1997_p3 }
  0x12   :  { %2007 = shalt.err (!%p2004_p7)  }
  0x13   :  { %s2295_s22 = smov [#allocation8]   ;;  %s23_s24 = sshll.u32 %s3173_s3, 4  ;;  %s24_s24 = int_to_ptr.vmem [resolvable:$true] %s23_s24 }
  0x14   :  { %18 = dma.vmem_to_smem %s16_s17, 16, %s2295_s22, [#allocation6] }
  0x15   :  { %s2008_s1 = scalar_lea.vmem %s20_s20, 16  ;;  %p2013_p9 = scmp.lt.s32.totalorder %s20_s20, %s20_s20 }
  0x16   :  { %p2009_p8 = scmp.ne.s32.totalorder %s20_s20, %s2008_s1  ;;  %p2014_p10 = scmp.lt.s32.totalorder %s2008_s1, %s2008_s1 }
  0x18   :  { %p2015_p11 = por %p2014_p10, %p2013_p9 }
  0x1a   :  { %p2016_p12 = pnand %p2015_p11, %p2009_p8 }
  0x1c   :  { %2019 = shalt.err (!%p2016_p12)  }
  0x1d   :  { %s2296_s2 = smov [#allocation9]   ;;  %s2020_s25 = scalar_lea.vmem %s24_s24, 16 }
  0x1e   :  { %22 = dma.vmem_to_smem %s20_s20, 16, %s2296_s2, [#allocation6] }
  0x1f   :  { %p2021_p13 = scmp.ne.s32.totalorder %s24_s24, %s2020_s25  ;;  %p2025_p0 = scmp.lt.s32.totalorder %s24_s24, %s24_s24 }
  0x20   :  { %p2026_p1 = scmp.lt.s32.totalorder %s2020_s25, %s2020_s25 }
  0x22   :  { %p2027_p2 = por %p2026_p1, %p2025_p0 }
  0x24   :  { %p2028_p3 = pnand %p2027_p2, %p2021_p13 }
  0x26   :  { %2031 = shalt.err (!%p2028_p3)  }
  0x27   :  { %s2297_s26 = smov [#allocation10]  }
  0x28   :  { %26 = dma.vmem_to_smem %s24_s24, 16, %s2297_s26, [#allocation6] }
  0x29   :  { %2212 = dma.done.wait [#allocation6], 64 }
  0x2a   :  { %2213 = vsyncadd [#allocation6], 4294967232 }
  0x2b   :  { %28 = sfence }
  0x2c   :  { %29 = vsyncpa [#allocation12], 0 }
  0x2d   :  { %31 = vsyncpa [#allocation12 + $0x1], 0 }
  0x2e   :  { %32 = vsyncpa [#allocation14], 0 }
  0x2f   :  { %34 = vsyncpa [#allocation14 + $0x1], 0  ;;  %s2377_s3 = smov 0   ;;  %s2379_s27 = smov 0  }
  0x30   :  { %s2381_s28 = smov 0   ;;  %s2383_s29 = smov 0  }
  0x31   :  { %s2385_s30 = smov 0   ;;  %s2387_s9 = smov 0  }
  0x32   :  { %s2389_s10 = smov 0   ;;  %s2391_s11 = smov 0  }
  0x33   :  { %s2393_s12 = smov 0   ;;  %s2395_s13 = smov 0  }
  0x34   :  { %s2397_s14 = smov 0  }
  0x35 LB: > { %3202 = sst [smem:[#allocation40_spill]] %s2272_s9  ;;  %s3180_s15 = sadd.s32 4294967295, %s2292_s14   ;;  %s2292_s14 = sphi %s2397_s14, %s40_s14   ;;  %s2288_s13 = sphi %s2395_s13, %s3252_s13   ;;  %s2284_s12 = sphi %s2393_s12, %s3251_s12   ;;  %s2280_s11 = sphi %s2391_s11, %s3250_s11   ;;  %s2276_s10 = sphi %s2389_s10, %s3249_s10   ;;  %s2272_s9 = sphi %s2387_s9, %s3241_s9   ;;  %s2268_s30 = sphi %s2385_s30, %s3248_s30   ;;  %s2264_s29 = sphi %s2383_s29, %s3247_s29   ;;  %s2260_s28 = sphi %s2381_s28, %s3246_s28   ;;  %s2256_s27 = sphi %s2379_s27, %s3245_s27   ;;  %s2252_s3 = sphi %s2377_s3, %s3244_s3  }
  0x36   : > { %3203 = sst [smem:[#allocation41_spill]] %s2276_s10  ;;  %p3174_p4 = scmp.eq.s32.totalorder %s2292_s14, 0 }
  0x37   : > { %3204 = sst [smem:[#allocation42_spill]] %s2280_s11  ;;  %p77_p5 = scmp.ne.s32.totalorder %s2268_s30, %s2264_s29 }
  0x38   : > { %p2433_p6 = scmp.eq.s32.totalorder %s3180_s15, 0  ;;  %p97_p7 = scmp.ne.s32.totalorder %s2260_s28, %s2256_s27 }
  0x39   : > { %p104_p9 = scmp.ne.s32.totalorder %s2256_s27, %s2252_s3  ;;  %p1874_p13 = scmp.ge.s32.totalorder %s2292_s14, 1 }
  0x3a   : > { %s3205_s16 = scalar_select %p2433_p6, 1, 0 }
  0x3b   : > { %p2441_p8 = por %p2433_p6, %p77_p5  ;;  %p2448_p10 = por %p97_p7, %p3174_p4 }
  0x3c   : > { %p2455_p12 = por %p104_p9, %p2433_p6  ;;  %s2298_s20 = smov [#allocation15]  }
  0x3d   : > { %s3206_s17 = scalar_select %p2441_p8, 1, 0 }
  0x3e   : > { %s3207_s18 = scalar_select %p2448_p10, 1, 0 }
  0x3f   : > { %s3208_s19 = scalar_select %p2455_p12, 1, 0 }
  0x40   : > { %s146_s21 = sshll.u32 %s2298_s20, 4  ;;  %p2462_p0 = pnand %p1874_p13, %p2433_p6  ;;  %s147_s21 = int_to_ptr.vmem [resolvable:$true] %s146_s21 }
  0x41   : > { %s3210_s6 = sld [smem:[#allocation47_spill]] }
  0x42   : > { %p2034_p2 = pneg %p2462_p0 }
  0x47   : > { %s2032_s24 = scalar_lea.hbm %s3210_s6, 512 }
  0x48   : > { %p2033_p1 = scmp.ne.s32.totalorder %s3210_s6, %s2032_s24  ;;  %p2039_p7 = scmp.lt.u32.totalorder %s2032_s24, %s3210_s6 }
  0x4a   : > { %p2035_p3 = pnand %p2034_p2, %p2033_p1 }
  0x4c   : > { %p2036_p5 = pneg %p2035_p3 }
  0x4e   : > { %p2041_p9 = pnand %p2039_p7, %p2036_p5 }
  0x50   : > { %2044 = shalt.err (!%p2041_p9)
}
  0x51   : > { %s2045_s3 = scalar_lea.vmem %s147_s21, 512  ;;  %p2053_p6 = scmp.lt.s32.totalorder %s147_s21, %s147_s21 }
  0x52   : > { %p2046_p13 = scmp.ne.s32.totalorder %s147_s21, %s2045_s3  ;;  %p2054_p12 = scmp.lt.s32.totalorder %s2045_s3, %s2045_s3 }
  0x54   : > { %p2048_p11 = pnand %p2046_p13, %p2034_p2  ;;  %p2055_p8 = por %p2054_p12, %p2053_p6 }
  0x56   : > { %p2049_p4 = pneg %p2048_p11 }
  0x58   : > { %p2056_p10 = pnand %p2055_p8, %p2049_p4 }
  0x5a   : > { %2059 = shalt.err (!%p2056_p10)
}
  0x5b   : > { %s3181_s29 = smov 128   ;;  %s3183_s20 = smov 8  }
  0x5c   : > { %1841 = dma.hbm_to_vmem [thread:$0]  (!%p2462_p0), %s3210_s6, 512, %s147_s21, [#allocation14], %s3181_s29, %s3181_s29, %s3183_s20  }
  0x5d   : > { %p3192_p4 = scmp.lt.s32.totalorder %s2292_s14, 6  ;;  %p3211_p6 = scmp.ne.s32.totalorder %s3207_s18, 0 }
  0x5e   : > { %s46_s1 = sadd.s32 1, %s2284_s12  ;;  %s49_s2 = sadd.s32 1, %s2288_s13 }
  0x5f   : > { %p2490_p8 = pnand %p3192_p4, %p3211_p6  ;;  %p47_p10 = scmp.ge.s32.totalorder %s46_s1, 3 }
  0x60   : > { %s53_s22 = sld [smem:[#allocation7 + %s2284_s12]]  ;;  %p70_p12 = scmp.ne.s32.totalorder %s2272_s9, %s2268_s30 }
  0x61   : > { %s3212_s24 = scalar_select %p2490_p8, 1, 0 }
  0x62   : > { %s54_s25 = sld [smem:[#allocation8 + %s2284_s12]]  ;;  %s3254_s1 = smov (%p47_p10, %s46_s1), 0 }
  0x63   : > { %3213 = sst [smem:[#allocation43_spill]] %s3254_s1  ;;  %s3256_s2 = smov (!%p47_p10, %s49_s2), %s2288_s13 }
  0x64   : > { %s55_s21 = sld [smem:[#allocation7 + %s3254_s1]]  ;;  %p51_p11 = scmp.ge.s32.totalorder %s3256_s2, 2 }
  0x65   : > { %s56_s26 = sld [smem:[#allocation8 + %s3254_s1]]  ;;  %s64_s7 = sadd.s32 1, %s2272_s9 }
  0x66   : > { %s80_s3 = sld [smem:[#allocation9 + %s2284_s12]]  ;;  %s3258_s2 = smov (%p51_p11, %s3256_s2), 0 }
  0x67   : > { %3214 = sst [smem:[#allocation44_spill]] %s3258_s2  ;;  %s57_s15 = ssub.s32 %s2288_s13, %s3258_s2 }
  0x68   : > { %s81_s0 = sld [smem:[#allocation10 + %s2284_s12]]  ;;  %p3215_p1 = scmp.eq.s32.totalorder %s2292_s14, 0 }
  0x69   : > { %s82_s23 = sld [smem:[#allocation9 + %s3254_s1]] }
  0x6a   : > { %s83_s29 = sld [smem:[#allocation10 + %s3254_s1]]  ;;  %s58_s20 = ssub.s32 %s53_s22, %s55_s21 }
  0x6b   : > { %s60_s6 = ssub.s32 %s54_s25, %s56_s26  ;;  %s59_s8 = sor.u32 %s58_s20, %s57_s15 }
  0x6c   : > { %s61_s11 = sor.u32 %s60_s6, %s59_s8  ;;  %p2519_p2 = por %p3215_p1, %p70_p12 }
  0x6d   : > { %p62_p0 = scmp.eq.s32.totalorder %s61_s11, 0  ;;  %s91_s8 = sadd.s32 1, %s2260_s28 }
  0x6e   : > { %s163_s25 = sand.u32 1, %s2272_s9   ;;  %p2548_p5 = pnand %p3192_p4, %p2519_p2 }
  0x6f   : > { %s85_s2 = ssub.s32 %s80_s3, %s82_s23  ;;  %s3194_s23 = sshll.u32 %s2288_s13, 5 }
  0x70   : > { %s2524_s22 = scalar_select %p62_p0, %s2272_s9, %s64_s7  }
  0x71   : > { %s86_s20 = sor.u32 %s85_s2, %s57_s15  ;;  %s87_s6 = ssub.s32 %s81_s0, %s83_s29 }
  0x72   : > { %3217 = sst [smem:[#allocation45_spill]] %s2524_s22  ;;  %s88_s11 = sor.u32 %s87_s6, %s86_s20 }
  0x73   : > { %p89_p3 = scmp.eq.s32.totalorder %s88_s11, 0  ;;  %s1648_s29 = sshll.u32 %s163_s25, 6 }
  0x74   : > { %s1809_s21 = scalar_select %p2519_p2, [#allocation7], [#allocation22] }
  0x75   : > { %s2531_s26 = scalar_select %p89_p3, %s2260_s28, %s91_s8  }
  0x76   : > { %s1810_s7 = scalar_select %p2519_p2, %s2284_s12, 0 }
  0x77   : > { %s3260_s21 = smov (!%p3192_p4, %s1809_s21), [#allocation26]  ;;  %s167_s8 = scalar_lea.vmem [#allocation11], %s1648_s29 }
  0x78   : > { %s3262_s7 = smov (!%p3192_p4, %s1810_s7), 0  ;;  %s180_s11 = sshll.u32 %s167_s8, 4  ;;  %s2562_s11 = int_to_ptr.vmem [resolvable:$true] %s180_s11 }
  0x79   : > { %s1811_s15 = scalar_select %p2519_p2, [#allocation8], [#allocation23] }
  0x7a   : > { %s168_s2 = sld [smem:[%s3260_s21 + %s3262_s7]]  ;;  %s192_s29 = sand.u32 1, %s2260_s28  }
  0x7b   : > { %s3264_s15 = smov (!%p3192_p4, %s1811_s15), [#allocation27]  ;;  %s3219_s4 = sld [smem:[#allocation46_spill]] }
  0x7c   : > { %s169_s0 = sld [smem:[%s3264_s15 + %s3262_s7]]  ;;  %p2062_p9 = pneg %p2548_p5 }
  0x7d   : > { %s1814_s20 = scalar_select %p3211_p6, [#allocation9], [#allocation24] }
  0x7e   : > { %s1815_s21 = scalar_select %p3211_p6, %s2284_s12, 0 }
  0x7f   : > { %s3266_s20 = smov (!%p3192_p4, %s1814_s20), [#allocation28] }
  0x80   : > { %s1713_s6 = sshll.u32 %s168_s2, 4  ;;  %s2572_s2 = scalar_lea.sflag [#allocation12], %s163_s25 }
  0x82   : > { %s175_s10 = sadd.s32 %s1713_s6, %s169_s0 }
  0x83   : > { %s177_s1 = sadd.s32 %s3194_s23, %s175_s10 }
  0x84   : > { %s1652_s22 = sshll.u32 %s177_s1, 7 }
  0x85   : > { %s2569_s9 = scalar_lea.hbm %s3219_s4, %s1652_s22  ;;  %s2065_s22 = scalar_lea.hbm %s3219_s4, 8192 }
  0x86   : > { %s2060_s8 = scalar_lea.hbm %s2569_s9, 1024  ;;  %p2066_p11 = scmp.lt.u32.totalorder %s2569_s9, %s3219_s4 }
  0x87   : > { %p2061_p7 = scmp.ne.s32.totalorder %s2569_s9, %s2060_s8  ;;  %p2067_p12 = scmp.lt.u32.totalorder %s2065_s22, %s2060_s8 }
  0x88   : > { %p2069_p1 = scmp.lt.u32.totalorder %s2060_s8, %s2569_s9 }
  0x89   : > { %p2063_p13 = pnand %p2062_p9, %p2061_p7  ;;  %p2068_p0 = por %p2067_p12, %p2066_p11 }
  0x8b   : > { %p2064_p10 = pneg %p2063_p13  ;;  %p2070_p2 = por %p2069_p1, %p2068_p0 }
  0x8d   : > { %p2071_p3 = pnand %p2070_p2, %p2064_p10 }
  0x8f   : > { %2074 = shalt.err (!%p2071_p3)
}
  0x90   : > { %s2075_s25 = scalar_lea.vmem %s2562_s11, 1024  ;;  %s2301_s7 = smov [#allocation11]  }
  0x91   : > { %p2076_p7 = scmp.ne.s32.totalorder %s2562_s11, %s2075_s25  ;;  %s2080_s15 = sshll.u32 %s2301_s7, 4  ;;  %s2081_s15 = int_to_ptr.vmem [resolvable:$false] %s2080_s15 }
  0x92   : > { %s2082_s1 = scalar_lea.vmem %s2081_s15, 2048  ;;  %p2083_p8 = scmp.lt.s32.totalorder %s2562_s11, %s2081_s15 }
  0x93   : > { %p2078_p13 = pnand %p2076_p7, %p2062_p9  ;;  %p2084_p11 = scmp.lt.s32.totalorder %s2082_s1, %s2075_s25 }
  0x95   : > { %p2079_p4 = pneg %p2078_p13  ;;  %p2085_p12 = por %p2084_p11, %p2083_p8 }
  0x97   : > { %p2086_p0 = pnand %p2085_p12, %p2079_p4 }
  0x99   : > { %2089 = shalt.err (!%p2086_p0)
}
  0x9a   : > { %s3195_s8 = smov 256   ;;  %s3220_s0 = smov 8  }
  0x9b   : > { %s3221_s22 = smov 128   ;;  %p3222_p4 = scmp.lt.s32.totalorder %s2292_s14, 6 }
  0x9c   : > { %1849 = dma.hbm_to_vmem [thread:$0]  (!%p2548_p5), %s2569_s9, 1024, %s2562_s11, %s2572_s2, %s3195_s8, %s3221_s22, %s3220_s0  }
  0x9d   : > { %s3268_s21 = smov (!%p3222_p4, %s1815_s21), 0  ;;  %s1653_s10 = sshll.u32 %s192_s29, 6 }
  0x9e   : > { %s1816_s3 = scalar_select %p3211_p6, [#allocation10], [#allocation25] }
  0x9f   : > { %s195_s6 = sld [smem:[%s3266_s20 + %s3268_s21]]  ;;  %p3223_p8 = pmov %p3222_p4 }
  0xa0   : > { %s190_s15 = sand.u32 1, %s2292_s14   ;;  %s194_s1 = scalar_lea.vmem [#allocation13], %s1653_s10 }
  0xa1   : > { %s3270_s3 = smov (!%p3223_p8, %s1816_s3), [#allocation29]  ;;  %s207_s23 = sshll.u32 %s194_s1, 4  ;;  %s2619_s23 = int_to_ptr.vmem [resolvable:$true] %s207_s23 }
  0xa2   : > { %s196_s25 = sld [smem:[%s3270_s3 + %s3268_s21]]  ;;  %s3224_s9 = sshll.u32 %s2288_s13, 5 }
  0xa3   : > { %s2626_s21 = scalar_lea.sflag [#allocation14], %s190_s15  ;;  %p3225_p5 = scmp.ne.s32.totalorder %s3212_s24, 0 }
  0xa4   : > { %s2095_s8 = scalar_lea.hbm %s3167_s5, 8192 }
  0xa5   : > { %s1714_s7 = sshll.u32 %s195_s6, 4  ;;  %p2092_p9 = pneg %p3225_p5 }
  0xa8   : > { %s202_s4 = sadd.s32 %s1714_s7, %s196_s25 }
  0xa9   : > { %s204_s11 = sadd.s32 %s3224_s9, %s202_s4 }
  0xaa   : > { %s1657_s2 = sshll.u32 %s204_s11, 7 }
  0xab   : > { %s2624_s20 = scalar_lea.hbm %s3167_s5, %s1657_s2 }
  0xac   : > { %s2090_s29 = scalar_lea.hbm %s2624_s20, 1024  ;;  %p2096_p2 = scmp.lt.u32.totalorder %s2624_s20, %s3167_s5 }
  0xad   : > { %p2091_p6 = scmp.ne.s32.totalorder %s2624_s20, %s2090_s29  ;;  %p2097_p3 = scmp.lt.u32.totalorder %s2095_s8, %s2090_s29 }
  0xae   : > { %p2099_p13 = scmp.lt.u32.totalorder %s2090_s29, %s2624_s20 }
  0xaf   : > { %p2093_p10 = pnand %p2092_p9, %p2091_p6  ;;  %p2098_p7 = por %p2097_p3, %p2096_p2 }
  0xb1   : > { %p2094_p1 = pneg %p2093_p10  ;;  %p2100_p11 = por %p2099_p13, %p2098_p7 }
  0xb3   : > { %p2101_p12 = pnand %p2100_p11, %p2094_p1 }
  0xb5   : > { %2104 = shalt.err (!%p2101_p12)
}
  0xb6   : > { %s2105_s25 = scalar_lea.vmem %s2619_s23, 1024  ;;  %s2303_s7 = smov [#allocation13]  }
  0xb7   : > { %p2106_p0 = scmp.ne.s32.totalorder %s2619_s23, %s2105_s25  ;;  %s2110_s15 = sshll.u32 %s2303_s7, 4  ;;  %s2111_s15 = int_to_ptr.vmem [resolvable:$false] %s2110_s15 }
  0xb8   : > { %s2112_s1 = scalar_lea.vmem %s2111_s15, 2048  ;;  %p2113_p6 = scmp.lt.s32.totalorder %s2619_s23, %s2111_s15 }
  0xb9   : > { %p2108_p4 = pnand %p2106_p0, %p2092_p9  ;;  %p2114_p10 = scmp.lt.s32.totalorder %s2112_s1, %s2105_s25 }
  0xbb   : > { %p2109_p8 = pneg %p2108_p4  ;;  %p2115_p2 = por %p2114_p10, %p2113_p6 }
  0xbd   : > { %p2116_p3 = pnand %p2115_p2, %p2109_p8 }
  0xbf   : > { %2119 = shalt.err (!%p2116_p3)
}
  0xc0   : > { %s3226_s9 = smov 256   ;;  %p3227_p9 = scmp.lt.s32.totalorder %s2292_s14, 1 }
  0xc1   : > { %1856 = dma.hbm_to_vmem [thread:$0]  (!%p3225_p5), %s2624_s20, 1024, %s2619_s23, %s2626_s21, %s3226_s9, %s3221_s22, %s3220_s0  }
  0xc2   : > { %217 = sbr.rel (%p3227_p9) target bundleno = 1060 (0x424), region = 36  ;;  %s219_s11 = sand.u32 (!%p3227_p9), 1, %s2268_s30  }
  0xc3   : > { %s1660_s2 = sshll.u32 (!%p3227_p9), %s219_s11, 6  ;;  %s220_s18 = scalar_lea.sflag (!%p3227_p9), [#allocation12], %s219_s11 }
  0xc4   : > { %s2660_s29 = scalar_lea.vmem (!%p3227_p9), [#allocation11], %s1660_s2  ;;  %p3228_p1 = scmp.ne.s32.totalorder (!%p3227_p9), %s3206_s17, 0 }
  0xc9   : > { %2215 = dma.done.wait (%p3228_p1), %s220_s18, 1024  }
  0xca   : > { %2217 = vsyncadd (%p3228_p1), %s220_s18, 4294966272  ;;  %s3229_s24 = sadd.s32 4294967295, %s2292_s14   ;;  %s230_s0 = sand.u32 1, %s2256_s27  }
  0xcb   : > { %s228_s23 = sand.u32 1, %s3229_s24   ;;  %s1661_s22 = sshll.u32 %s230_s0, 6 }
  0xcc   : > { %s229_s20 = scalar_lea.sflag [#allocation14], %s228_s23  ;;  %s2669_s21 = scalar_lea.vmem [#allocation13], %s1661_s22 }
  0xcd   : > { %p3230_p5 = scmp.ne.s32.totalorder %s3208_s19, 0 }
  0xcf   : > { %2219 = dma.done.wait (%p3230_p5), %s229_s20, 1024  }
  0xd0   : > { %2221 = vsyncadd (%p3230_p5), %s229_s20, 4294966272  ;;  %p3231_p7 = scmp.ne.s32.totalorder %s3205_s16, 0 }
  0xd2   : > { %2223 = dma.done.wait (%p3231_p7), [#allocation14], 512  }
  0xd3   : > { %2225 = vsyncadd (%p3231_p7), [#allocation14], 4294966784  ;;  %s3232_s17 = sld [smem:[#allocation41_spill]]  ;;  %s3196_s8 = smov 0   ;;  %vm301_vm0 = vcmask 261120   ;;  %v288_v1 = vld [vmem:[#allocation15] sm:$0xff]  ;;  %v436_v17 = vlaneseq }
  0xd4   : > { %s3233_s6 = sld [smem:[#allocation48_spill]]  ;;  %v289_v2 = vld [vmem:[#allocation15 + $0x8] sm:$0xff]  ;;  %v290_v4 = vld [vmem:[#allocation15 + $0x10] sm:$0xff]  ;;  %v291_v5 = vld [vmem:[#allocation15 + $0x18] sm:$0xff]  ;;  %v2305_v15 = vmov 1983009808  }
  0xd5   : > { %v2695_v3 = vpack.c.bf16 %v289_v2, %v288_v1  ;;  %v293_v6 = vld [vmem:[%s2660_s29] sm:$0xff]  ;;  %v2698_v7 = vpack.c.bf16 %v291_v5, %v290_v4  ;;  %v294_v9 = vld [vmem:[%s2660_s29 + $0x8] sm:$0xff]  ;;  %v295_v11 = vld [vmem:[%s2660_s29 + $0x10] sm:$0xff]  ;;  %v434_v16 = vunpack.c.l.s4 %v2305_v15  ;;  %v2306_v18 = vmov 1934713408  }
  0xd6   : > { %1751 = vmatprep.mubr.msk.f32.mxu0 %vm301_vm0, %v293_v6  ;;  %v297_v8 = vld [vmem:[%s2660_s29 + $0x20] sm:$0xff]  ;;  %v298_v10 = vld [vmem:[%s2660_s29 + $0x28] sm:$0xff]  ;;  %v299_v12 = vld [vmem:[%s2660_s29 + $0x30] sm:$0xff]  ;;  %v498_v19 = vunpack.c.l.s4 %v2306_v18  ;;  %v2729_v21 = vshrl.u32 %v436_v17, 7 }
  0xd7   : > { %1784 = vmatprep.subr.bf16.mxu0 %v2695_v3  ;;  %1799 = vmatprep.subr.bf16.mxu1 %v2695_v3  ;;  %v296_v13 = vld [vmem:[%s2660_s29 + $0x18] sm:$0xff]  ;;  %v435_v20 = vunpack.c.0.s8 %v434_v16 }
  0xd8   : > { %1786 = vmatpush3.bf16.msra.mxu0 %v2695_v3  ;;  %1801 = vmatpush3.bf16.msra.mxu1 %v2695_v3  ;;  %v300_v14 = vld [vmem:[%s2660_s29 + $0x38] sm:$0xff]  ;;  %v499_v24 = vunpack.c.0.s8 %v498_v19 }
  0xd9   : > { %p1878_p13 = scmp.eq.s32.totalorder %s3232_s17, 0  ;;  %s2681_s4 = sld [smem:[#allocation7 + %s3232_s17]]  ;;  %1788 = vmatprep.subr.bf16.mxu0 %v2698_v7  ;;  %1800 = vmatprep.subr.bf16.mxu1 %v2698_v7  ;;  %v2740_v27 = vsub.s32 %v435_v20, %v2729_v21 }
  0xda   : > { %s2684_s3 = sld [smem:[#allocation8 + %s3232_s17]]  ;;  %v2693_v0 = vld [vmem:[%s3233_s6] sm:$0x1]  ;;  %1757 = vmatprep.mubr.msk.f32.mxu1 %vm301_vm0, %v297_v8  ;;  %s269_s10 = ssub.s32 0, %s3232_s17  ;;  %v2747_v30 = vsub.s32 %v499_v24, %v2729_v21 }
  0xdb   : > { %1824 = sst [smem:[#allocation5]] (%p1878_p13), %s3196_s8  ;;  %s1663_s25 = smin.u32 %s3232_s17, %s269_s10 }
  0xdc   : > { %1825 = sst [smem:[#allocation5 + $0x1]] (%p1878_p13), %s3196_s8  ;;  %1790 = vmatpush3.bf16.msra.mxu0 %v2698_v7  ;;  %1802 = vmatpush3.bf16.msra.mxu1 %v2698_v7  ;;  %s271_s7 = sand.u32 1, %s1663_s25  }
  0xdd   : > { %p268_p12 = scmp.lt.s32.totalorder %s3232_s17, 0  ;;  %s272_s15 = ssub.s32 0, %s271_s7 }
  0xde   : > { %p1879_p4 = scmp.ge.s32.totalorder %s3232_s17, 2 }
  0xdf   : > { %1752 = vmatmul.mubr.msk.f32.vlgmr.msra.gmra.mrb[0].mxu0 %vm301_vm0, %v294_v9  ;;  %1758 = vmatmul.mubr.msk.f32.vlgmr.msra.gmra.mrb[0].mxu1 %vm301_vm0, %v298_v10  ;;  %s3272_s15 = smov (!%p268_p12, %s272_s15), %s271_s7 }
  0xe0   : > { %p267_p11 = scmp.ne.s32.totalorder %s2681_s4, %s2684_s3  ;;  %1754 = vmatprep.mubr.msk.f32.mxu0 %vm301_vm0, %v295_v11  ;;  %1760 = vmatprep.mubr.msk.f32.mxu1 %vm301_vm0, %v299_v12  ;;  %p1665_p0 = scmp.lt.s32.totalorder %s3272_s15, 0 }
  0xe1   : > { %s278_s1 = sadd.s32 2, %s3272_s15 }
  0xe2   : > { %s3274_s1 = smov (!%p1665_p0, %s278_s1), %s3272_s15 }
  0xe3   : > { %1755 = vmatmul.mubr.msk.f32.gmra.mrb[2].mxu0 %vm301_vm0, %v296_v13  ;;  %1761 = vmatmul.mubr.msk.f32.gmra.mrb[2].mxu1 %vm301_vm0, %v300_v14  ;;  %s2802_s9 = scalar_lea.sflag [#allocation4], %s3274_s1 }
 0x1b2   : > { %v2731_v22 = vpop.f32.mrb[0].mxu0  ;;  %v2733_v23 = vpop.f32.mrb[0].mxu1 }
 0x1b3   : > { %v2735_v25 = vpop.f32.mrb[1].mxu0  ;;  %v2737_v26 = vpop.f32.mrb[1].mxu1 }
 0x1b6   : > { %v2742_v28 = vpop.f32.mrb[2].mxu0  ;;  %v2744_v29 = vpop.f32.mrb[2].mxu1 }
 0x1b7   : > { %v447_v31 = vcombine.low %v2731_v22, %v2742_v28  ;;  %v448_v32 = vcombine.high %v2731_v22, %v2742_v28  ;;  %v479_v33 = vcombine.low %v2733_v23, %v2744_v29  ;;  %v480_v34 = vcombine.high %v2733_v23, %v2744_v29  ;;  %v2757_v35 = vpop.f32.mrb[3].mxu0  ;;  %v2759_v36 = vpop.f32.mrb[3].mxu1 }
 0x1b8   : > { %v431_v37 = vcombine.low %v2735_v25, %v2757_v35  ;;  %v432_v38 = vcombine.high %v2735_v25, %v2757_v35  ;;  %v463_v39 = vcombine.low %v2737_v26, %v2759_v36  ;;  %v464_v40 = vcombine.high %v2737_v26, %v2759_v36 }
 0x1b9   : > { %v455_v41 = vrot.slane %v447_v31, %v2740_v27  ;;  %v462_v42 = vrot.slane %v448_v32, %v2740_v27  ;;  %v487_v43 = vrot.slane %v479_v33, %v2740_v27  ;;  %v494_v44 = vrot.slane %v480_v34, %v2740_v27 }
 0x1ba   : > { %v439_v45 = vrot.slane %v431_v37, %v2740_v27  ;;  %v446_v46 = vrot.slane %v432_v38, %v2740_v27  ;;  %v471_v47 = vrot.slane %v463_v39, %v2740_v27  ;;  %v478_v48 = vrot.slane %v464_v40, %v2740_v27 }
 0x1bc   : > { %v495_v49 = vcombine.low %v439_v45, %v455_v41  ;;  %v496_v50 = vcombine.high %v439_v45, %v455_v41  ;;  %v511_v51 = vcombine.low %v446_v46, %v462_v42  ;;  %v512_v52 = vcombine.high %v446_v46, %v462_v42 }
 0x1bd   : > { %v527_v53 = vcombine.low %v471_v47, %v487_v43  ;;  %v528_v54 = vcombine.high %v471_v47, %v487_v43  ;;  %v543_v55 = vcombine.low %v478_v48, %v494_v44  ;;  %v544_v56 = vcombine.high %v478_v48, %v494_v44 }
 0x1be   : > { %v503_v57 = vrot.slane %v495_v49, %v2747_v30  ;;  %v510_v58 = vrot.slane %v496_v50, %v2747_v30  ;;  %v519_v59 = vrot.slane %v511_v51, %v2747_v30  ;;  %v526_v60 = vrot.slane %v512_v52, %v2747_v30 }
 0x1bf   : > { %v535_v61 = vrot.slane %v527_v53, %v2747_v30  ;;  %v542_v62 = vrot.slane %v528_v54, %v2747_v30  ;;  %v551_v63 = vrot.slane %v543_v55, %v2747_v30  ;;  %v558_v1 = vrot.slane %v544_v56, %v2747_v30 }
 0x1c1   : > { %v2785_v2 = vcombine.low %v503_v57, %v535_v61  ;;  %v2787_v4 = vcombine.high %v503_v57, %v535_v61  ;;  %v2789_v5 = vcombine.low %v510_v58, %v542_v62  ;;  %v2791_v6 = vcombine.high %v510_v58, %v542_v62 }
 0x1c2   : > { %v2793_v8 = vcombine.low %v519_v59, %v551_v63  ;;  %v2795_v9 = vcombine.high %v519_v59, %v551_v63  ;;  %v2797_v10 = vcombine.low %v526_v60, %v558_v1  ;;  %v2799_v11 = vcombine.high %v526_v60, %v558_v1 }
 0x1c3   : > { %2227 = dma.done.wait (%p1879_p4), %s2802_s9, 512 }
 0x1c4   : > { %2229 = vsyncadd (%p1879_p4), %s2802_s9, 4294966784  ;;  %s2811_s11 = scalar_lea.sflag %s2802_s9, 2 [#allocation4]  ;;  %s576_s2 = sld [smem:[#allocation5 + %s3274_s1]] }
 0x1ca   : > { %p1880_p8 = scmp.eq.s32.totalorder %s576_s2, 1 }
 0x1cc   : > { %2231 = dma.done.wait (%p1880_p8), %s2811_s11, 512 }
 0x1cd   : > { %2233 = vsyncadd (%p1880_p8), %s2811_s11, 4294966784  ;;  %s1677_s18 = sshll.u32 %s2681_s4, 3  ;;  %s1678_s29 = sshll.u32 %s2684_s3, 3 }
 0x1ce   : > { %s1679_s24 = sshll.u32 %s2681_s4, 9  ;;  %s1680_s23 = sshll.u32 %s2684_s3, 9 }
 0x1cf   : > { %p1681_p6 = scmp.eq.s32.totalorder %s2681_s4, %s2684_s3 }
 0x1d0   : > { %1792 = vmatprep.subr.bf16.mxu0 (!%p1681_p6), %v2695_v3  ;;  %1803 = vmatprep.subr.bf16.mxu1 (!%p1681_p6), %v2695_v3  ;;  %v594_v12 = vld [vmem:[%s2669_s21] sm:$0xff] (!%p1681_p6)  ;;  %v595_v14 = vld [vmem:[%s2669_s21 + $0x8] sm:$0xff] (!%p1681_p6)  ;;  %v596_v16 = vld [vmem:[%s2669_s21 + $0x10] sm:$0xff] (!%p1681_p6)  ;;  %s2307_s0 = smov (!%p1681_p6), 64   ;;  %s3234_s22 = sld [smem:[#allocation42_spill]] (!%p1681_p6)  ;;  %vm1041_vm1 = vcmask (!%p1681_p6), 523264  }
 0x1d1   : > { %593 = sbr.rel (%p1681_p6) target bundleno = 858 (0x35a), region = 64  ;;  %v598_v13 = vld [vmem:[%s2669_s21 + $0x20] sm:$0xff] (!%p1681_p6)  ;;  %1794 = vmatpush3.bf16.msra.mxu0 (!%p1681_p6), %v2695_v3  ;;  %1805 = vmatpush3.bf16.msra.mxu1 (!%p1681_p6), %v2695_v3  ;;  %v599_v15 = vld [vmem:[%s2669_s21 + $0x28] sm:$0xff] (!%p1681_p6)  ;;  %v600_v17 = vld [vmem:[%s2669_s21 + $0x30] sm:$0xff] (!%p1681_p6)  ;;  %s1231_s20 = sshra.s32 (!%p1681_p6), %s1679_s24, 7 }
 0x1d2   : > { %1796 = vmatprep.subr.bf16.mxu0 (!%p1681_p6), %v2698_v7  ;;  %1804 = vmatprep.subr.bf16.mxu1 (!%p1681_p6), %v2698_v7  ;;  %v597_v3 = vld [vmem:[%s2669_s21 + $0x18] sm:$0xff] (!%p1681_p6)  ;;  %s1236_s17 = sadd.s32 (!%p1681_p6), %s1678_s29, %s1231_s20  ;;  %s3235_s2 = sld [smem:[#allocation49_spill]] (!%p1681_p6) }
 0x1d3   : > { %1771 = vmatprep.mubr.msk.f32.mxu0 (!%p1681_p6), %vm301_vm0, %v594_v12  ;;  %1777 = vmatprep.mubr.msk.f32.mxu1 (!%p1681_p6), %vm301_vm0, %v598_v13  ;;  %v601_v18 = vld [vmem:[%s2669_s21 + $0x38] sm:$0xff] (!%p1681_p6)  ;;  %s1715_s21 = sshll.u32 (!%p1681_p6), %s3274_s1, 5 }
 0x1d4   : > { %s1226_s6 = scalar_lea.vmem (!%p1681_p6), [#allocation3], %s1715_s21 }
 0x1d5   : > { %1798 = vmatpush3.bf16.msra.mxu0 (!%p1681_p6), %v2698_v7  ;;  %1806 = vmatpush3.bf16.msra.mxu1 (!%p1681_p6), %v2698_v7  ;;  %v878_v7 = vsub.s32 (!%p1681_p6), 0, %v2729_v21  ;;  %s1250_s25 = sshll.u32 (!%p1681_p6), %s1226_s6, 4  ;;  %s1251_s25 = int_to_ptr.vmem [resolvable:$true] %s1250_s25 }
 0x1d6   : > { %s1694_s16 = sshll.u32 (!%p1681_p6), %s3234_s22, 4  ;;  %s2120_s24 = scalar_lea.vmem (!%p1681_p6), %s1251_s25, 512 }
 0x1d7   : > { %v2848_v20 = vrot.slane (!%p1681_p6), %v2693_v0, %v878_v7  ;;  %s1238_s19 = sadd.s32 (!%p1681_p6), %s1694_s16, %s1236_s17  ;;  %p2121_p10 = scmp.ne.s32.totalorder (!%p1681_p6), %s1251_s25, %s2120_s24 }
 0x1d8   : > { %1772 = vmatmul.mubr.msk.f32.vlgmr.msra.gmra.mrb[0].mxu0 %vm301_vm0, %v595_v14  ;;  %1778 = vmatmul.mubr.msk.f32.vlgmr.msra.gmra.mrb[0].mxu1 %vm301_vm0, %v599_v15  ;;  %s1695_s10 = sshll.u32 %s1238_s19, 7 }
 0x1d9   : > { %1774 = vmatprep.mubr.msk.f32.mxu0 %vm301_vm0, %v596_v16  ;;  %1780 = vmatprep.mubr.msk.f32.mxu1 %vm301_vm0, %v600_v17  ;;  %s1240_s29 = scalar_lea.hbm %s3235_s2, %s1695_s10 }
 0x1dc   : > { %1775 = vmatmul.mubr.msk.f32.gmra.mrb[2].mxu0 %vm301_vm0, %v597_v3  ;;  %1781 = vmatmul.mubr.msk.f32.gmra.mrb[2].mxu1 %vm301_vm0, %v601_v18 }
 0x2ab   : > { %v1773_v19 = vpop.f32.mrb[0].mxu0  ;;  %v1779_v24 = vpop.f32.mrb[0].mxu1 }
 0x2ac   : > { %v1054_v31 = vadd.f32 %v1773_v19, %v2787_v4  ;;  %v1058_v32 = vadd.f32 %v1779_v24, %v2795_v9  ;;  %v692_v33 = vpop.f32.mrb[1].mxu0  ;;  %v712_v34 = vpop.f32.mrb[1].mxu1 }
 0x2ad   : > { %v1053_v37 = vadd.f32 %v692_v33, %v2785_v2  ;;  %v1057_v38 = vadd.f32 %v712_v34, %v2793_v8 }
 0x2ae   : > { %v2855_v39 = vadd.f32 %v1054_v31, %v2848_v20  ;;  %v2858_v40 = vadd.f32 %v1058_v32, %v2848_v20 }
 0x2af   : > { %v2861_v41 = vadd.f32 %v1053_v37, %v2848_v20  ;;  %v2864_v42 = vadd.f32 %v1057_v38, %v2848_v20  ;;  %v1776_v43 = vpop.f32.mrb[2].mxu0  ;;  %v1782_v44 = vpop.f32.mrb[2].mxu1 }
 0x2b0   : > { %v747_v45 = vcombine.low %v1773_v19, %v1776_v43  ;;  %v748_v46 = vcombine.high %v1773_v19, %v1776_v43  ;;  %v1056_v47 = vadd.f32 %v1776_v43, %v2791_v6  ;;  %v779_v48 = vcombine.low %v1779_v24, %v1782_v44  ;;  %v702_v49 = vpop.f32.mrb[3].mxu0  ;;  %v722_v50 = vpop.f32.mrb[3].mxu1 }
 0x2b1   : > { %v780_v51 = vcombine.high %v1779_v24, %v1782_v44  ;;  %v1060_v52 = vadd.f32 %v1782_v44, %v2799_v11  ;;  %v731_v53 = vcombine.low %v692_v33, %v702_v49  ;;  %v732_v54 = vcombine.high %v692_v33, %v702_v49 }
 0x2b2   : > { %v755_v55 = vrot.slane %v747_v45, %v2740_v27  ;;  %v762_v56 = vrot.slane %v748_v46, %v2740_v27  ;;  %v2871_v57 = vadd.f32 %v1056_v47, %v2848_v20  ;;  %v787_v58 = vrot.slane %v779_v48, %v2740_v27 }
 0x2b3   : > { %v794_v59 = vrot.slane %v780_v51, %v2740_v27  ;;  %v2876_v60 = vadd.f32 %v1060_v52, %v2848_v20  ;;  %v739_v61 = vrot.slane %v731_v53, %v2740_v27  ;;  %v746_v62 = vrot.slane %v732_v54, %v2740_v27 }
 0x2b4   : > { %v1055_v63 = vadd.f32 %v702_v49, %v2789_v5  ;;  %v763_v1 = vcombine.low %v712_v34, %v722_v50  ;;  %v764_v12 = vcombine.high %v712_v34, %v722_v50  ;;  %v1059_v13 = vadd.f32 %v722_v50, %v2797_v10 }
 0x2b5   : > { %v795_v14 = vcombine.low %v739_v61, %v755_v55  ;;  %v796_v15 = vcombine.high %v739_v61, %v755_v55  ;;  %v811_v16 = vcombine.low %v746_v62, %v762_v56  ;;  %v812_v17 = vcombine.high %v746_v62, %v762_v56 }
 0x2b6   : > { %v1063_v3 = vadd.f32 %v1055_v63, %v2848_v20  ;;  %v771_v18 = vrot.slane %v763_v1, %v2740_v27  ;;  %v778_v7 = vrot.slane %v764_v12, %v2740_v27  ;;  %v1067_v19 = vadd.f32 %v1059_v13, %v2848_v20 }
 0x2b7   : > { %v803_v24 = vrot.slane %v795_v14, %v2747_v30  ;;  %v810_v31 = vrot.slane %v796_v15, %v2747_v30  ;;  %v819_v32 = vrot.slane %v811_v16, %v2747_v30  ;;  %v826_v33 = vrot.slane %v812_v17, %v2747_v30 }
 0x2b8   : > { %v1069_v34 = vcombine.low %v2861_v41, %v1063_v3  ;;  %v1070_v37 = vcombine.high %v2861_v41, %v1063_v3  ;;  %v827_v38 = vcombine.low %v771_v18, %v787_v58  ;;  %v828_v43 = vcombine.high %v771_v18, %v787_v58 }
 0x2b9   : > { %v843_v44 = vcombine.low %v778_v7, %v794_v59  ;;  %v844_v45 = vcombine.high %v778_v7, %v794_v59  ;;  %v1101_v46 = vcombine.low %v2864_v42, %v1067_v19  ;;  %v1102_v47 = vcombine.high %v2864_v42, %v1067_v19 }
 0x2ba   : > { %v835_v48 = vrot.slane %v827_v38, %v2747_v30  ;;  %v842_v49 = vrot.slane %v828_v43, %v2747_v30  ;;  %v1084_v50 = vrot.slane %v1070_v37, %v2740_v27  ;;  %v1086_v51 = vcombine.high %v2855_v39, %v2871_v57 }
 0x2bb   : > { %v851_v52 = vrot.slane %v843_v44, %v2747_v30  ;;  %v858_v41 = vrot.slane %v844_v45, %v2747_v30  ;;  %v1116_v53 = vrot.slane %v1102_v47, %v2740_v27  ;;  %v1118_v54 = vcombine.high %v2858_v40, %v2876_v60 }
 0x2bc   : > { %v859_v55 = vcombine.low %v803_v24, %v835_v48  ;;  %v860_v42 = vcombine.high %v803_v24, %v835_v48  ;;  %v861_v56 = vcombine.low %v810_v31, %v842_v49  ;;  %v862_v58 = vcombine.high %v810_v31, %v842_v49 }
 0x2bd   : > { %v863_v59 = vcombine.low %v819_v32, %v851_v52  ;;  %v864_v61 = vcombine.high %v819_v32, %v851_v52  ;;  %v865_v62 = vcombine.low %v826_v33, %v858_v41  ;;  %v866_v63 = vcombine.high %v826_v33, %v858_v41 }
 0x2be   : > { %v867_v1 = vadd.f32 %v859_v55, %v2735_v25  ;;  %v868_v12 = vadd.f32 %v2731_v22, %v860_v42  ;;  %v869_v13 = vadd.f32 %v861_v56, %v2757_v35  ;;  %v870_v14 = vadd.f32 %v2742_v28, %v862_v58 }
 0x2bf   : > { %v871_v15 = vadd.f32 %v863_v59, %v2737_v26  ;;  %v872_v16 = vadd.f32 %v2733_v23, %v864_v61  ;;  %v873_v17 = vadd.f32 %v865_v62, %v2759_v36  ;;  %v874_v3 = vadd.f32 %v2744_v29, %v866_v63 }
 0x2c0   : > { %v881_v18 = vadd.f32 %v2848_v20, %v867_v1  ;;  %v882_v7 = vadd.f32 %v2848_v20, %v868_v12  ;;  %v883_v19 = vadd.f32 %v2848_v20, %v869_v13  ;;  %v884_v24 = vadd.f32 %v2848_v20, %v870_v14 }
 0x2c1   : > { %v885_v31 = vadd.f32 %v2848_v20, %v871_v15  ;;  %v886_v32 = vadd.f32 %v2848_v20, %v872_v16  ;;  %v887_v33 = vadd.f32 %v2848_v20, %v873_v17  ;;  %v888_v37 = vadd.f32 %v2848_v20, %v874_v3 }
 0x2c2   : > { %v1100_v38 = vrot.slane %v1086_v51, %v2740_v27  ;;  %v1132_v43 = vrot.slane %v1118_v54, %v2740_v27  ;;  %v1077_v44 = vrot.slane %v1069_v34, %v2740_v27  ;;  %v1085_v45 = vcombine.low %v2855_v39, %v2871_v57 }
 0x2c3   : > { %v1109_v47 = vrot.slane %v1101_v46, %v2740_v27  ;;  %v1117_v48 = vcombine.low %v2858_v40, %v2876_v60  ;;  %v889_v49 = vcombine.low %v881_v18, %v883_v19  ;;  %v905_v52 = vcombine.low %v882_v7, %v884_v24 }
 0x2c4   : > { %v1149_v41 = vcombine.low %v1084_v50, %v1100_v38  ;;  %v1181_v55 = vcombine.low %v1116_v53, %v1132_v43  ;;  %v1093_v20 = vrot.slane %v1085_v45, %v2740_v27  ;;  %v1150_v42 = vcombine.high %v1084_v50, %v1100_v38 }
 0x2c5   : > { %v1125_v51 = vrot.slane %v1117_v48, %v2740_v27  ;;  %v1182_v54 = vcombine.high %v1116_v53, %v1132_v43  ;;  %v897_v34 = vrot.slane %v889_v49, %v2740_v27  ;;  %v913_v56 = vrot.slane %v905_v52, %v2740_v27 }
 0x2c6   : > { %v2933_v39 = vrot.slane %v1149_v41, %v2747_v30  ;;  %v2936_v57 = vrot.slane %v1181_v55, %v2747_v30  ;;  %v1133_v40 = vcombine.low %v1077_v44, %v1093_v20  ;;  %v2939_v60 = vrot.slane %v1150_v42, %v2747_v30 }
 0x2c7   : > { %v1165_v46 = vcombine.low %v1109_v47, %v1125_v51  ;;  %v2942_v50 = vrot.slane %v1182_v54, %v2747_v30  ;;  %v1134_v58 = vcombine.high %v1077_v44, %v1093_v20  ;;  %v1166_v53 = vcombine.high %v1109_v47, %v1125_v51 }
 0x2c8   : > { %v1202_v59 = vcombine.high %v2933_v39, %v2936_v57  ;;  %v1201_v61 = vcombine.low %v2933_v39, %v2936_v57  ;;  %v2949_v62 = vrot.slane %v1133_v40, %v2747_v30  ;;  %v921_v63 = vcombine.low %v885_v31, %v887_v33 }
 0x2c9   : > { %v2952_v1 = vrot.slane %v1165_v46, %v2747_v30  ;;  %v1204_v12 = vcombine.high %v2939_v60, %v2942_v50  ;;  %v2957_v13 = vrot.slane %v1134_v58, %v2747_v30  ;;  %v2960_v14 = vrot.slane %v1166_v53, %v2747_v30 }
 0x2ca   : > { %1214 = vrot.lane.b32.xlu1 %v1202_v59, %s2307_s0  ;;  %v929_v15 = vrot.slane %v921_v63, %v2740_v27  ;;  %v937_v16 = vcombine.low %v886_v32, %v888_v37  ;;  %v954_v17 = vcombine.high %v897_v34, %v913_v56  ;;  %v953_v3 = vcombine.low %v897_v34, %v913_v56 }
 0x2cb   : > { %v1198_v38 = vcombine.high %v2949_v62, %v2952_v1  ;;  %v1197_v43 = vcombine.low %v2949_v62, %v2952_v1  ;;  %v1200_v44 = vcombine.high %v2957_v13, %v2960_v14  ;;  %v890_v45 = vcombine.high %v881_v18, %v883_v19 }
 0x2cc   : > { %v945_v47 = vrot.slane %v937_v16, %v2740_v27  ;;  %v2972_v48 = vrot.slane %v954_v17, %v2747_v30  ;;  %v2975_v49 = vrot.slane %v953_v3, %v2747_v30  ;;  %v906_v52 = vcombine.high %v882_v7, %v884_v24 }
 0x2cd   : > { %1206 = vrot.lane.b32.xlu0 %v1198_v38, %s2307_s0  ;;  %v904_v41 = vrot.slane %v890_v45, %v2740_v27  ;;  %v922_v55 = vcombine.high %v885_v31, %v887_v33  ;;  %v938_v20 = vcombine.high %v886_v32, %v888_v37  ;;  %v1203_v42 = vcombine.low %v2939_v60, %v2942_v50 }
 0x2ce   : > { %1218 = vrot.lane.b32.xlu1 %v1204_v12, %s2307_s0  ;;  %v986_v18 = vcombine.high %v929_v15, %v945_v47  ;;  %v985_v19 = vcombine.low %v929_v15, %v945_v47  ;;  %v920_v51 = vrot.slane %v906_v52, %v2740_v27  ;;  %v1199_v54 = vcombine.low %v2957_v13, %v2960_v14 }
 0x2cf   : > { %v936_v7 = vrot.slane %v922_v55, %v2740_v27  ;;  %v952_v24 = vrot.slane %v938_v20, %v2740_v27 }
 0x2d0   : > { %v2988_v34 = vrot.slane %v986_v18, %v2747_v30  ;;  %v2991_v31 = vrot.slane %v985_v19, %v2747_v30  ;;  %v970_v32 = vcombine.high %v904_v41, %v920_v51  ;;  %v969_v33 = vcombine.low %v904_v41, %v920_v51 }
 0x2d1   : > { %1210 = vrot.lane.b32.xlu0 %v1200_v44, %s2307_s0  ;;  %v1002_v37 = vcombine.high %v936_v7, %v952_v24  ;;  %v1001_v56 = vcombine.low %v936_v7, %v952_v24 }
 0x2d2   : > { %v1020_v40 = vcombine.high %v2972_v48, %v2988_v34  ;;  %v1018_v60 = vcombine.high %v2975_v49, %v2991_v31  ;;  %v2999_v46 = vrot.slane %v970_v32, %v2747_v30  ;;  %v3002_v50 = vrot.slane %v969_v33, %v2747_v30 }
 0x2d3   : > { %v3005_v58 = vrot.slane %v1002_v37, %v2747_v30  ;;  %v3008_v53 = vrot.slane %v1001_v56, %v2747_v30  ;;  %v1019_v59 = vcombine.low %v2972_v48, %v2988_v34  ;;  %v1017_v62 = vcombine.low %v2975_v49, %v2991_v31 }
 0x2d4   : > { %1030 = vrot.lane.b32.xlu1 %v1020_v40, %s2307_s0 }
 0x2d5   : > { %1026 = vrot.lane.b32.xlu0 %v1018_v60, %s2307_s0  ;;  %v1024_v63 = vcombine.high %v2999_v46, %v3005_v58  ;;  %v1022_v1 = vcombine.high %v3002_v50, %v3008_v53  ;;  %v1023_v12 = vcombine.low %v2999_v46, %v3005_v58  ;;  %v1021_v13 = vcombine.low %v3002_v50, %v3008_v53 }
 0x2d8   : > { %1038 = vrot.lane.b32.xlu1 %v1024_v63, %s2307_s0 }
 0x2d9   : > { %1034 = vrot.lane.b32.xlu0 %v1022_v1, %s2307_s0  ;;  %s2308_s0 = smov [#allocation3]  }
 0x2da   : > { %s2122_s22 = sshll.u32 %s2308_s0, 4  ;;  %s2123_s22 = int_to_ptr.vmem [resolvable:$false] %s2122_s22 }
 0x2db   : > { %s2124_s20 = scalar_lea.vmem %s2123_s22, 1024  ;;  %p2125_p2 = scmp.lt.s32.totalorder %s1251_s25, %s2123_s22 }
 0x2dc   : > { %p2126_p3 = scmp.lt.s32.totalorder %s2124_s20, %s2120_s24 }
 0x2de   : > { %p2127_p9 = por %p2126_p3, %p2125_p2 }
 0x2e0   : > { %p2128_p1 = pnand %p2127_p9, %p2121_p10 }
 0x33c   : > { %v1215_v14 = vpop.permute.xlu1 %1214 }
 0x33d   : > { %v1223_v15 = vsel %vm1041_vm1, %v1201_v61, %v1215_v14 }
 0x33e   : > { %1229 = vst [vmem:[%s1226_s6 + $0x10] sm:$0xff] %v1223_v15 }
 0x33f   : > { %v1207_v16 = vpop.permute.xlu0 %1206 }
 0x340   : > { %v1221_v17 = vsel %vm1041_vm1, %v1197_v43, %v1207_v16  ;;  %v1219_v3 = vpop.permute.xlu1 %1218 }
 0x341   : > { %1227 = vst [vmem:[%s1226_s6] sm:$0xff] %v1221_v17  ;;  %v1224_v38 = vsel %vm1041_vm1, %v1203_v42, %v1219_v3 }
 0x342   : > { %1230 = vst [vmem:[%s1226_s6 + $0x18] sm:$0xff] %v1224_v38 }
 0x343   : > { %v1211_v44 = vpop.permute.xlu0 %1210 }
 0x344   : > { %v1222_v39 = vsel %vm1041_vm1, %v1199_v54, %v1211_v44 }
 0x345   : > { %1228 = vst [vmem:[%s1226_s6 + $0x8] sm:$0xff] %v1222_v39 }
 0x346   : > { %v1031_v57 = vpop.permute.xlu1 %1030 }
 0x347   : > { %2131 = shalt.err (!%p2128_p1)  }
 0x348   : > { %s2132_s17 = scalar_lea.hbm %s1240_s29, 512  ;;  %s2134_s10 = scalar_lea.hbm %s3235_s2, 4096 }
 0x349   : > { %p2133_p5 = scmp.ne.s32.totalorder %s1240_s29, %s2132_s17  ;;  %p2135_p7 = scmp.lt.u32.totalorder %s1240_s29, %s3235_s2 }
 0x34a   : > { %p2136_p13 = scmp.lt.u32.totalorder %s2134_s10, %s2132_s17  ;;  %p2138_p0 = scmp.lt.u32.totalorder %s2132_s17, %s1240_s29 }
 0x34c   : > { %p2137_p12 = por %p2136_p13, %p2135_p7 }
 0x34e   : > { %p2139_p4 = por %p2138_p0, %p2137_p12 }
 0x350   : > { %p2140_p8 = pnand %p2139_p4, %p2133_p5 }
 0x352   : > { %2143 = shalt.err (!%p2140_p8)  }
 0x353   : > { %1253 = dma.vmem_to_hbm [thread:$0]  %s1251_s25, 512, %s1240_s29, %s2811_s11  ;;  %v1043_v61 = vsel %vm1041_vm1, %v1019_v59, %v1031_v57  ;;  %v1027_v43 = vpop.permute.xlu0 %1026  ;;  %v1039_v47 = vpop.permute.xlu1 %1038 }
 0x354   : > { %s1048_s15 = scalar_lea.vmem [#allocation2], %s1715_s21  ;;  %v1042_v45 = vsel %vm1041_vm1, %v1017_v62, %v1027_v43  ;;  %v1045_v48 = vsel %vm1041_vm1, %v1023_v12, %v1039_v47 }
 0x355   : > { %1050 = vst [vmem:[%s1048_s15 + $0x8] sm:$0xff] %v1043_v61  ;;  %1049 = vst [vmem:[%s1048_s15] sm:$0xff] %v1042_v45 }
 0x356   : > { %1052 = vst [vmem:[%s1048_s15 + $0x18] sm:$0xff] %v1045_v48 }
 0x357   : > { %v1035_v49 = vpop.permute.xlu0 %1034 }
 0x358   : > { %v1044_v52 = vsel %vm1041_vm1, %v1021_v13, %v1035_v49 }
 0x359   : > { %1051 = vst [vmem:[%s1048_s15 + $0x10] sm:$0xff] %v1044_v52 }
 0x35a PF: > { %1257 = sbr.rel (%p267_p11) target bundleno = 997 (0x3e5), region = 72  ;;  %v1258_v41 = vadd.f32 (!%p267_p11), %v2785_v2, %v2735_v25  ;;  %v1259_v55 = vadd.f32 (!%p267_p11), %v2731_v22, %v2787_v4  ;;  %v1260_v20 = vadd.f32 (!%p267_p11), %v2789_v5, %v2757_v35  ;;  %v1261_v42 = vadd.f32 (!%p267_p11), %v2742_v28, %v2791_v6  ;;  %s2309_s11 = smov (!%p267_p11), 64  }
 0x35b   : > { %v1269_v18 = vsub.s32 (!%p267_p11), 0, %v2729_v21  ;;  %v1262_v19 = vadd.f32 (!%p267_p11), %v2793_v8, %v2737_v26  ;;  %v1263_v51 = vadd.f32 (!%p267_p11), %v2733_v23, %v2795_v9  ;;  %v1264_v25 = vadd.f32 (!%p267_p11), %v2797_v10, %v2759_v36  ;;  %s1717_s21 = sshll.u32 (!%p267_p11), %s3274_s1, 5 }
 0x35c   : > { %v1265_v22 = vadd.f32 (!%p267_p11), %v2744_v29, %v2799_v11  ;;  %vm1432_vm2 = vcmask (!%p267_p11), 523264   ;;  %s1439_s25 = scalar_lea.vmem (!%p267_p11), [#allocation2], %s1717_s21 }
 0x35d   : > { %v1270_v2 = vrot.slane (!%p267_p11), %v2693_v0, %v1269_v18 }
 0x35f   : > { %v1272_v35 = vadd.f32 (!%p267_p11), %v1270_v2, %v1258_v41  ;;  %v1273_v4 = vadd.f32 (!%p267_p11), %v1270_v2, %v1259_v55  ;;  %v1274_v5 = vadd.f32 (!%p267_p11), %v1270_v2, %v1260_v20  ;;  %v1275_v28 = vadd.f32 (!%p267_p11), %v1270_v2, %v1261_v42 }
 0x360   : > { %v1276_v6 = vadd.f32 (!%p267_p11), %v1270_v2, %v1262_v19  ;;  %v1277_v21 = vadd.f32 (!%p267_p11), %v1270_v2, %v1263_v51  ;;  %v1278_v54 = vadd.f32 (!%p267_p11), %v1270_v2, %v1264_v25  ;;  %v1279_v7 = vadd.f32 (!%p267_p11), %v1270_v2, %v1265_v22 }
 0x361   : > { %v1281_v26 = vcombine.high %v1272_v35, %v1274_v5  ;;  %v1297_v8 = vcombine.high %v1273_v4, %v1275_v28  ;;  %v1280_v24 = vcombine.low %v1272_v35, %v1274_v5  ;;  %v1296_v23 = vcombine.low %v1273_v4, %v1275_v28 }
 0x362   : > { %v1313_v9 = vcombine.high %v1276_v6, %v1278_v54  ;;  %v1329_v34 = vcombine.high %v1277_v21, %v1279_v7  ;;  %v1312_v36 = vcombine.low %v1276_v6, %v1278_v54  ;;  %v1328_v10 = vcombine.low %v1277_v21, %v1279_v7 }
 0x363   : > { %v1295_v29 = vrot.slane %v1281_v26, %v2740_v27  ;;  %v1311_v0 = vrot.slane %v1297_v8, %v2740_v27  ;;  %v1288_v11 = vrot.slane %v1280_v24, %v2740_v27  ;;  %v1304_v31 = vrot.slane %v1296_v23, %v2740_v27 }
 0x364   : > { %v1327_v32 = vrot.slane %v1313_v9, %v2740_v27  ;;  %v1343_v33 = vrot.slane %v1329_v34, %v2740_v27  ;;  %v1320_v37 = vrot.slane %v1312_v36, %v2740_v27  ;;  %v1336_v56 = vrot.slane %v1328_v10, %v2740_v27 }
 0x365   : > { %v1360_v40 = vcombine.low %v1295_v29, %v1311_v0  ;;  %v1344_v60 = vcombine.low %v1288_v11, %v1304_v31  ;;  %v1361_v46 = vcombine.high %v1295_v29, %v1311_v0  ;;  %v1345_v50 = vcombine.high %v1288_v11, %v1304_v31 }
 0x366   : > { %v1392_v58 = vcombine.low %v1327_v32, %v1343_v33  ;;  %v1376_v53 = vcombine.low %v1320_v37, %v1336_v56  ;;  %v1393_v59 = vcombine.high %v1327_v32, %v1343_v33  ;;  %v1377_v62 = vcombine.high %v1320_v37, %v1336_v56 }
 0x367   : > { %v1368_v63 = vrot.slane %v1360_v40, %v2747_v30  ;;  %v1352_v1 = vrot.slane %v1344_v60, %v2747_v30  ;;  %v1375_v12 = vrot.slane %v1361_v46, %v2747_v30  ;;  %v1359_v13 = vrot.slane %v1345_v50, %v2747_v30 }
 0x368   : > { %v1400_v14 = vrot.slane %v1392_v58, %v2747_v30  ;;  %v1384_v27 = vrot.slane %v1376_v53, %v2747_v30  ;;  %v1407_v15 = vrot.slane %v1393_v59, %v2747_v30  ;;  %v1391_v16 = vrot.slane %v1377_v62, %v2747_v30 }
 0x36a   : > { %v1413_v17 = vcombine.high %v1368_v63, %v1400_v14  ;;  %v1412_v3 = vcombine.low %v1368_v63, %v1400_v14  ;;  %v1409_v38 = vcombine.high %v1352_v1, %v1384_v27  ;;  %v1408_v44 = vcombine.low %v1352_v1, %v1384_v27 }
 0x36b   : > { %v1414_v39 = vcombine.low %v1375_v12, %v1407_v15  ;;  %v1410_v57 = vcombine.low %v1359_v13, %v1391_v16  ;;  %v1415_v61 = vcombine.high %v1375_v12, %v1407_v15  ;;  %v1411_v43 = vcombine.high %v1359_v13, %v1391_v16 }
 0x36c   : > { %1425 = vrot.lane.b32.xlu1 %v1413_v17, %s2309_s11  ;;  %1417 = vrot.lane.b32.xlu0 %v1409_v38, %s2309_s11 }
 0x370   : > { %1429 = vrot.lane.b32.xlu1 %v1415_v61, %s2309_s11  ;;  %1421 = vrot.lane.b32.xlu0 %v1411_v43, %s2309_s11 }
 0x3de   : > { %v1426_v45 = vpop.permute.xlu1 %1425  ;;  %v1418_v47 = vpop.permute.xlu0 %1417 }
 0x3df   : > { %v1435_v48 = vsel %vm1432_vm2, %v1412_v3, %v1426_v45  ;;  %v1433_v49 = vsel %vm1432_vm2, %v1408_v44, %v1418_v47 }
 0x3e0   : > { %1442 = vst [vmem:[%s1439_s25 + $0x10] sm:$0xff] %v1435_v48  ;;  %1440 = vst [vmem:[%s1439_s25] sm:$0xff] %v1433_v49 }
 0x3e2   : > { %v1430_v30 = vpop.permute.xlu1 %1429  ;;  %v1422_v52 = vpop.permute.xlu0 %1421 }
 0x3e3   : > { %v1436_v41 = vsel %vm1432_vm2, %v1414_v39, %v1430_v30  ;;  %v1434_v55 = vsel %vm1432_vm2, %v1410_v57, %v1422_v52 }
 0x3e4   : > { %1443 = vst [vmem:[%s1439_s25 + $0x18] sm:$0xff] %v1436_v41  ;;  %1441 = vst [vmem:[%s1439_s25 + $0x8] sm:$0xff] %v1434_v55 }
 0x3e5 PF: > { %s3236_s2 = sld [smem:[#allocation42_spill]]  ;;  %s1718_s29 = sshll.u32 %s3274_s1, 5 }
 0x3e6   : > { %s1447_s24 = sshra.s32 %s1680_s23, 7  ;;  %s1446_s20 = scalar_lea.vmem [#allocation2], %s1718_s29 }
 0x3e7   : > { %s1452_s0 = sadd.s32 %s1677_s18, %s1447_s24  ;;  %s1465_s17 = sshll.u32 %s1446_s20, 4  ;;  %s1466_s17 = int_to_ptr.vmem [resolvable:$true] %s1465_s17 }
 0x3e8   : > { %s3237_s6 = sld [smem:[#allocation49_spill]]  ;;  %s2144_s11 = scalar_lea.vmem %s1466_s17, 512 }
 0x3e9   : > { %p2145_p6 = scmp.ne.s32.totalorder %s1466_s17, %s2144_s11  ;;  %s2310_s21 = smov [#allocation2]  }
 0x3ea   : > { %s2146_s25 = sshll.u32 %s2310_s21, 4  ;;  %s2147_s25 = int_to_ptr.vmem [resolvable:$false] %s2146_s25 }
 0x3eb   : > { %s1702_s22 = sshll.u32 %s3236_s2, 4  ;;  %s2148_s8 = scalar_lea.vmem %s2147_s25, 1024 }
 0x3ec   : > { %s1454_s16 = sadd.s32 %s1702_s22, %s1452_s0  ;;  %p2149_p10 = scmp.lt.s32.totalorder %s1466_s17, %s2147_s25 }
 0x3ed   : > { %s1703_s19 = sshll.u32 %s1454_s16, 7  ;;  %p2150_p2 = scmp.lt.s32.totalorder %s2148_s8, %s2144_s11 }
 0x3ee   : > { %s1456_s15 = scalar_lea.hbm %s3237_s6, %s1703_s19 }
 0x3ef   : > { %p2151_p3 = por %p2150_p2, %p2149_p10 }
 0x3f1   : > { %p2152_p9 = pnand %p2151_p3, %p2145_p6 }
 0x3f3   : > { %2155 = shalt.err (!%p2152_p9)  }
 0x3f4   : > { %s2156_s18 = scalar_lea.hbm %s1456_s15, 512  ;;  %s2158_s29 = scalar_lea.hbm %s3237_s6, 4096 }
 0x3f5   : > { %p2157_p1 = scmp.ne.s32.totalorder %s1456_s15, %s2156_s18  ;;  %p2159_p5 = scmp.lt.u32.totalorder %s1456_s15, %s3237_s6 }
 0x3f6   : > { %p2160_p7 = scmp.lt.u32.totalorder %s2158_s29, %s2156_s18  ;;  %p2162_p12 = scmp.lt.u32.totalorder %s2156_s18, %s1456_s15 }
 0x3f8   : > { %p2161_p13 = por %p2160_p7, %p2159_p5 }
 0x3fa   : > { %p2163_p0 = por %p2162_p12, %p2161_p13 }
 0x3fc   : > { %p2164_p4 = pnand %p2163_p0, %p2157_p1 }
 0x3fe   : > { %2167 = shalt.err (!%p2164_p4)  }
 0x3ff   : > { %s3238_s8 = sld [smem:[#allocation41_spill]]  ;;  %s1470_s20 = scalar_lea.smem [#allocation5], %s3274_s1 }
 0x400   : > { %1468 = dma.vmem_to_hbm [thread:$0]  %s1466_s17, 512, %s1456_s15, %s2802_s9 }
 0x401   : > { %s1469_s22 = scalar_select %p267_p11, 1, 0 }
 0x403   : > { %1471 = sst [smem:[%s1470_s20]] %s1469_s22 }
 0x405   : > { %p1881_p8 = scmp.eq.s32.totalorder %s3238_s8, 2 }
 0x407   : > { %2235 = dma.done.wait (%p1881_p8), %s2802_s9, 512 }
 0x408   : > { %2237 = vsyncadd (%p1881_p8), %s2802_s9, 4294966784  ;;  %p1882_p6 = scmp.ge.s32.totalorder %s3238_s8, 1  ;;  %s1484_s16 = ssub.s32 1, %s3274_s1 }
 0x409   : > { %s1485_s19 = scalar_lea.sflag [#allocation4], %s1484_s16 }
 0x40a   : > { %p1859_p10 = pnand %p1882_p6, %p1881_p8 }
 0x40c   : > { %2239 = dma.done.wait (!%p1859_p10), %s1485_s19, 512 }
 0x40d   : > { %2241 = vsyncadd (!%p1859_p10), %s1485_s19, 4294966784  ;;  %s1488_s4 = sld [smem:[#allocation5]] }
 0x413   : > { %p1883_p11 = scmp.eq.s32.totalorder %s1488_s4, 1 }
 0x415   : > { %p1862_p2 = pnand %p1883_p11, %p1881_p8 }
 0x417   : > { %2243 = dma.done.wait (!%p1862_p2), [#allocation4 + $0x2], 512 }
 0x418   : > { %2245 = vsyncadd (!%p1862_p2), [#allocation4 + $0x2], 4294966784  ;;  %s3239_s3 = smov 0   ;;  %s1707_s9 = sld [smem:[#allocation5 + $0x1]] }
 0x419   : > { %1867 = sst [smem:[#allocation5]] (!%p1862_p2), %s3239_s3 }
 0x41e   : > { %p1884_p3 = scmp.eq.s32.totalorder %s1707_s9, 1 }
 0x420   : > { %p1868_p9 = pnand %p1884_p3, %p1881_p8 }
 0x422   : > { %2247 = dma.done.wait (!%p1868_p9), [#allocation4 + $0x3], 512 }
 0x423   : > { %2249 = vsyncadd (!%p1868_p9), [#allocation4 + $0x3], 4294966784  ;;  %1873 = sst [smem:[#allocation5 + $0x1]] (!%p1868_p9), %s3239_s3 }
 0x424 PF: > { %s40_s14 = sadd.s32 1, %s2292_s14   ;;  %s3240_s1 = sld [smem:[#allocation40_spill]] }
 0x425   : > { %p37_p1 = scmp.ge.s32.totalorder %s40_s14, 7   ;;  %s3241_s9 = sld [smem:[#allocation45_spill]] }
 0x426   : > { %s3242_s17 = sld [smem:[#allocation43_spill]]  ;;  %s3243_s7 = sld [smem:[#allocation44_spill]] }
 0x427   : > { %s3244_s3 = smov %s2256_s27  ;;  %s3245_s27 = smov %s2260_s28 }
 0x428   : > { %s3246_s28 = smov %s2531_s26  ;;  %s3247_s29 = smov %s2268_s30 }
 0x429   : > { %s3249_s10 = smov %s2284_s12  ;;  %s3250_s11 = smov %s2288_s13 }
 0x42a   : > { %s3248_s30 = smov %s3240_s1  ;;  %39 = sbr.rel (!%p37_p1) target bundleno = 53 (0x35), region = 142 }
 0x42c   : > { %s3251_s12 = smov %s3242_s17  ;;  %s3252_s13 = smov %s3243_s7 }
 0x431   :  { %1508 = vsyncpa [#allocation12], 1 }
 0x432   :  { %1510 = vsyncpa [#allocation12 + $0x1], 1 }
 0x433   :  { %1511 = vsyncpa [#allocation14], 1 }
 0x434   :  { %1513 = vsyncpa [#allocation14 + $0x1], 1 }
 0x435   :  { %1514 = vsyncmov [#allocation4] }
 0x438   :  { %s1515_s26 = vpop.sfrf %1514 }
 0x439   :  { %p1709_p5 = scmp.ne.s32.totalorder %s1515_s26, 0 }
 0x43b   :  { %1519 = shalt.err (%p1709_p5)  }
 0x43c   :  { %1521 = vsyncmov [#allocation4 + $0x1] }
 0x43f   :  { %s1522_s6 = vpop.sfrf %1521 }
 0x440   :  { %p1710_p7 = scmp.ne.s32.totalorder %s1522_s6, 0 }
 0x442   :  { %1526 = shalt.err (%p1710_p7)  }
 0x443   :  { %1528 = vsyncmov [#allocation4 + $0x2] }
 0x446   :  { %s1529_s15 = vpop.sfrf %1528 }
 0x447   :  { %p1711_p13 = scmp.ne.s32.totalorder %s1529_s15, 0 }
 0x449   :  { %1533 = shalt.err (%p1711_p13)  }
 0x44a   :  { %1535 = vsyncmov [#allocation4 + $0x3] }
 0x44d   :  { %s1536_s21 = vpop.sfrf %1535 }
 0x44e   :  { %p1712_p12 = scmp.ne.s32.totalorder %s1536_s21, 0 }
 0x450   :  { %1540 = shalt.err (%p1712_p12)  }

</bundles_post_ra>
